<compile_context>
chip_gen: v7x
topology: tpu7x:2x2x1
jax: 0.10.0
libtpu: 0.0.40
codegen_flags: <defaults>
</compile_context>

<pallas_src>
import functools

import jax
import jax.numpy as jnp
from jax.experimental import pallas as pl
from jax.experimental.pallas import tpu as pltpu

_VMEM_LIMIT_BYTES = 40 * 1024 * 1024   # safe scoped limit on v5e/v6e/v7x


def _h_swish(v):
    # x * ReLU6(x + 3) / 6
    return v * jnp.clip(v + 3.0, 0.0, 6.0) * (1.0 / 6.0)


def _sigmoid(v):
    return 1.0 / (1.0 + jnp.exp(-v))


def _round_up(n, m):
    return ((n + m - 1) // m) * m


# ---------------------------------------------------------------------------
# Kernel 1: dual pooling + CoordAtt MLPs + fused SE statistic + SE MLP.
#   outputs: a_h (B,H,C) and a_ws = a_w * s (B,W,C)   (s = SE channel gate)
# ---------------------------------------------------------------------------
def _coord_se_kernel(x_ref, w1_ref, s1_ref, b1_ref, wh_ref, bh_ref,
                     ww_ref, bw_ref, w1se_ref, b1se_ref, w2se_ref, b2se_ref,
                     ah_ref, aws_ref, pw_acc, t_acc, *, inv_H, inv_W, inv_HW):
    # NOTE: the VMEM accumulators (pw_acc, t_acc) rely on the row axis being
    # the innermost *sequential* grid axis (grid=(B, n_r), "arbitrary").
    # Do not reorder the grid without revisiting this.
    r = pl.program_id(1)
    n_r = pl.num_programs(1)

    x = x_ref[0]                                   # (TH, W, C) f32

    def coord_mlp(pooled, wo_ref, bo_ref):         # (L, C) -> (L, C)
        y = jnp.dot(pooled, w1_ref[...], preferred_element_type=jnp.float32)
        y = _h_swish(y * s1_ref[...] + b1_ref[...])      # conv1 bias + BN folded
        a = jnp.dot(y, wo_ref[...], preferred_element_type=jnp.float32) + bo_ref[...]
        return _sigmoid(a)

    # h path: mean over W is local to this row tile -> emit a_h rows now.
    pool_h = jnp.sum(x, axis=1) * inv_W            # (TH, C)
    a_h = coord_mlp(pool_h, wh_ref, bh_ref)        # (TH, C)
    ah_ref[0] = a_h

    @pl.when(r == 0)
    def _():
        pw_acc[...] = jnp.zeros_like(pw_acc)
        t_acc[...] = jnp.zeros_like(t_acc)

    # w path pooling (mean over H) crosses row tiles -> accumulate.
    pw_acc[...] += jnp.sum(x, axis=0) * inv_H                   # (W, C)
    # SE statistic factorization: t[w,c] = sum_h x[h,w,c] * a_h[h,c]
    t_acc[...] += jnp.sum(x * a_h[:, None, :], axis=0)          # (W, C)

    @pl.when(r == n_r - 1)
    def _():
        a_w = coord_mlp(pw_acc[...], ww_ref, bw_ref)            # (W, C)
        # g[c] = mean_{h,w} x*a_h*a_w  (exact, via the factorization above)
        g = jnp.sum(a_w * t_acc[...], axis=0, keepdims=True) * inv_HW   # (1, C)
        h = jnp.dot(g, w1se_ref[...], preferred_element_type=jnp.float32) + b1se_ref[...]
        h = jnp.maximum(h, 0.0)                                 # ReLU
        s = _sigmoid(jnp.dot(h, w2se_ref[...],
                             preferred_element_type=jnp.float32) + b2se_ref[...])  # (1, C)
        aws_ref[0] = a_w * s                                    # fold SE gate into a_w


# ---------------------------------------------------------------------------
# Kernel 2: apply CoordAtt + SE gates in one elementwise streaming pass.
#   out = x * a_h * (a_w * s)
# ---------------------------------------------------------------------------
def _apply_gates_kernel(x_ref, ah_ref, aws_ref, o_ref):
    x = x_ref[0]                                   # (TH, W, C)
    o_ref[0] = x * ah_ref[0][:, None, :] * aws_ref[0][None, :, :]


# ---------------------------------------------------------------------------
# wrapper
# ---------------------------------------------------------------------------
def _pick_row_tile(H, W, C, row_tile=None, budget_bytes=4 << 20):
    """Largest multiple-of-8 divisor of H whose (TH, W, C) f32 block fits budget."""
    if row_tile is not None:
        assert H % row_tile == 0 and (row_tile % 8 == 0 or row_tile == H)
        return row_tile
    if H % 8 != 0 or H * W * C * 4 <= budget_bytes:
        return H                                   # small / irregular H: full rows
    th = 8
    for cand in range(8, H + 1, 8):
        if H % cand == 0 and cand * W * C * 4 <= budget_bytes:
            th = cand
    return th


def se_coord_att_forward_nhwc(x_nhwc, p, row_tile=None):
    """SE_CoordAtt forward on NHWC activations. x: (B, H, W, C) f32 -> same."""
    B, H, W, C = x_nhwc.shape
    x = x_nhwc.astype(jnp.float32)

    mip = p["w1"].shape[1]
    cr = p["w1se"].shape[1]
    th = _pick_row_tile(H, W, C, row_tile)
    n_r = H // th

    # Fold conv1 bias + BatchNorm2d(mip) (eval mode) into per-channel scale/bias.
    s1 = p["bn1_gamma"] * jax.lax.rsqrt(p["bn1_var"] + 1e-5)
    b1 = (p["b1"] - p["bn1_mean"]) * s1 + p["bn1_beta"]

    # Zero-pad bottleneck widths to a multiple of 128 so the in-kernel matmuls
    # are lane-dense.  Padded columns produce h_swish(0)/relu(0)=0 and the
    # padded rows of the second matmul are zero, so the result is exact.
    mip_p = _round_up(max(mip, 8), 128)
    cr_p = _round_up(max(cr, 1), 128)

    def pad_cols(a, n):
        return jnp.pad(a, ((0, 0), (0, n - a.shape[-1])))

    def pad_rows(a, n):
        return jnp.pad(a, ((0, n - a.shape[0]), (0, 0)))

    w1_p = pad_cols(p["w1"], mip_p)                    # (C, mip_p)
    s1_p = pad_cols(s1.reshape(1, mip), mip_p)         # (1, mip_p)
    b1_p = pad_cols(b1.reshape(1, mip), mip_p)         # (1, mip_p)
    wh_p = pad_rows(p["wh"], mip_p)                    # (mip_p, C)
    ww_p = pad_rows(p["ww"], mip_p)                    # (mip_p, C)
    w1se_p = pad_cols(p["w1se"], cr_p)                 # (C, cr_p)
    b1se_p = pad_cols(p["b1se"].reshape(1, cr), cr_p)  # (1, cr_p)
    w2se_p = pad_rows(p["w2se"], cr_p)                 # (cr_p, C)

    x_spec = pl.BlockSpec((1, th, W, C), lambda b, r: (b, r, 0, 0))
    const2 = lambda b, r: (0, 0)

    # ---- K1: dual pooling + CoordAtt MLPs + SE statistic + SE MLP ---------
    a_h, a_ws = pl.pallas_call(
        functools.partial(_coord_se_kernel,
                          inv_H=1.0 / float(H), inv_W=1.0 / float(W),
                          inv_HW=1.0 / float(H * W)),
        out_shape=(jax.ShapeDtypeStruct((B, H, C), jnp.float32),
                   jax.ShapeDtypeStruct((B, W, C), jnp.float32)),
        grid=(B, n_r),
        in_specs=[
            x_spec,
            pl.BlockSpec((C, mip_p), const2),
            pl.BlockSpec((1, mip_p), const2),
            pl.BlockSpec((1, mip_p), const2),
            pl.BlockSpec((mip_p, C), const2),
            pl.BlockSpec((1, C), const2),
            pl.BlockSpec((mip_p, C), const2),
            pl.BlockSpec((1, C), const2),
            pl.BlockSpec((C, cr_p), const2),
            pl.BlockSpec((1, cr_p), const2),
            pl.BlockSpec((cr_p, C), const2),
            pl.BlockSpec((1, C), const2),
        ],
        out_specs=(pl.BlockSpec((1, th, C), lambda b, r: (b, r, 0)),
                   pl.BlockSpec((1, W, C), lambda b, r: (b, 0, 0))),
        scratch_shapes=[pltpu.VMEM((W, C), jnp.float32),    # pool_w accumulator
                        pltpu.VMEM((W, C), jnp.float32)],   # SE factorized accumulator
        compiler_params=pltpu.CompilerParams(
            dimension_semantics=("parallel", "arbitrary"),
            vmem_limit_bytes=_VMEM_LIMIT_BYTES),
    )(x, w1_p, s1_p, b1_p, wh_p, p["bh"].reshape(1, C), ww_p,
      p["bw"].reshape(1, C), w1se_p, b1se_p, w2se_p, p["b2se"].reshape(1, C))

    # ---- K2: final elementwise gating  out = x * a_h * (a_w * s) -----------
    out = pl.pallas_call(
        _apply_gates_kernel,
        out_shape=jax.ShapeDtypeStruct((B, H, W, C), jnp.float32),
        grid=(B, n_r),
        in_specs=[
            x_spec,
            pl.BlockSpec((1, th, C), lambda b, r: (b, r, 0)),
            pl.BlockSpec((1, W, C), lambda b, r: (b, 0, 0)),
        ],
        out_specs=pl.BlockSpec((1, th, W, C), lambda b, r: (b, r, 0, 0)),
        compiler_params=pltpu.CompilerParams(
            dimension_semantics=("parallel", "parallel"),
            vmem_limit_bytes=_VMEM_LIMIT_BYTES),
    )(x, a_h, a_ws)

    return out


def se_coord_att_forward(x_nchw, p, row_tile=None):
    """PyTorch-layout entry point: (B, C, H, W) -> (B, C, H, W).

    NOTE: the two transposes below are XLA copies *outside* the kernels
    (~2 extra reads + 2 writes of x).  Keep the surrounding model NHWC and
    call se_coord_att_forward_nhwc directly to avoid them.
    """
    x = jnp.transpose(x_nchw, (0, 2, 3, 1))
    out = se_coord_att_forward_nhwc(x, p, row_tile)
    return jnp.transpose(out, (0, 3, 1, 2))


# ---------------------------------------------------------------------------
# pure-jnp reference (same eval-mode BN folding) and parameter init
# ---------------------------------------------------------------------------
def se_coord_att_reference(x_nchw, p):
    x = jnp.transpose(x_nchw, (0, 2, 3, 1)).astype(jnp.float32)   # (B,H,W,C)
    s1 = p["bn1_gamma"] * jax.lax.rsqrt(p["bn1_var"] + 1e-5)
    b1 = (p["b1"] - p["bn1_mean"]) * s1 + p["bn1_beta"]

    pool_h = jnp.mean(x, axis=2)                   # (B,H,C)  mean over W
    pool_w = jnp.mean(x, axis=1)                   # (B,W,C)  mean over H
    yh = _h_swish(jnp.dot(pool_h, p["w1"]) * s1 + b1)
    yw = _h_swish(jnp.dot(pool_w, p["w1"]) * s1 + b1)
    a_h = _sigmoid(jnp.dot(yh, p["wh"]) + p["bh"])   # (B,H,C)
    a_w = _sigmoid(jnp.dot(yw, p["ww"]) + p["bw"])   # (B,W,C)
    out = x * a_h[:, :, None, :] * a_w[:, None, :, :]
    g = jnp.mean(out, axis=(1, 2))                 # (B,C)
    h = jnp.maximum(jnp.dot(g, p["w1se"]) + p["b1se"], 0.0)
    s = _sigmoid(jnp.dot(h, p["w2se"]) + p["b2se"])  # (B,C)
    out = out * s[:, None, None, :]
    return jnp.transpose(out, (0, 3, 1, 2))


def init_params(key, C, coord_reduction=32, se_reduction=16):
    mip = max(8, C // coord_reduction)             # CoordAtt bottleneck width
    cr = max(1, C // se_reduction)                 # SE bottleneck width
    ks = jax.random.split(key, 10)

    def nrm(k, shape, scale=0.05):
        return scale * jax.random.normal(k, shape, dtype=jnp.float32)

    # conv weights stored as (in, out) for NHWC matmuls (PyTorch (out,in,1,1)^T)
    return {
        "w1": nrm(ks[0], (C, mip)), "b1": nrm(ks[1], (mip,)),
        "bn1_gamma": jnp.ones((mip,), jnp.float32),
        "bn1_beta": jnp.zeros((mip,), jnp.float32),
        "bn1_mean": jnp.zeros((mip,), jnp.float32),
        "bn1_var": jnp.ones((mip,), jnp.float32),
        "wh": nrm(ks[2], (mip, C)), "bh": nrm(ks[3], (C,)),
        "ww": nrm(ks[4], (mip, C)), "bw": nrm(ks[5], (C,)),
        "w1se": nrm(ks[6], (C, cr)), "b1se": nrm(ks[7], (cr,)),
        "w2se": nrm(ks[8], (cr, C)), "b2se": nrm(ks[9], (C,)),
    }


if __name__ == "__main__":
    # SE reduction=16 requires C >= 16; C=128 keeps the channel axis lane-dense.
    B, C, H, W = 2, 128, 16, 16
    key = jax.random.PRNGKey(0)
    kx, kp = jax.random.split(key)
    x = jax.random.normal(kx, (B, C, H, W), dtype=jnp.float32)     # NCHW input
    params = init_params(kp, C)

    ref = jax.block_until_ready(se_coord_att_reference(x, params))

    # row_tile=8 exercises the cross-tile pool_w / SE accumulators.
    out = jax.block_until_ready(se_coord_att_forward(x, params, row_tile=8))
    assert out.shape == (B, C, H, W)
    assert bool(jnp.all(jnp.isfinite(out)))
    err = float(jnp.max(jnp.abs(out - ref)))
    assert err < 1e-4, f"max abs error vs reference (row_tile=8): {err}"

    # Default tile selection (full-H rows at this size; single-tile finalize).
    out2 = jax.block_until_ready(se_coord_att_forward(x, params))
    err2 = float(jnp.max(jnp.abs(out2 - ref)))
    assert err2 < 1e-4, f"max abs error vs reference (auto tile): {err2}"

    print("KERNEL_OK")
</pallas_src>

<mosaic_0001>
module attributes {stable_mosaic.version = 11 : i64} {
  func.func @_coord_se_kernel(%arg0: i32, %arg1: i32, %arg2: memref<1x8x16x128xf32, #tpu.memory_space<vmem>>, %arg3: memref<128x128xf32, #tpu.memory_space<vmem>>, %arg4: memref<1x128xf32, #tpu.memory_space<vmem>>, %arg5: memref<1x128xf32, #tpu.memory_space<vmem>>, %arg6: memref<128x128xf32, #tpu.memory_space<vmem>>, %arg7: memref<1x128xf32, #tpu.memory_space<vmem>>, %arg8: memref<128x128xf32, #tpu.memory_space<vmem>>, %arg9: memref<1x128xf32, #tpu.memory_space<vmem>>, %arg10: memref<128x128xf32, #tpu.memory_space<vmem>>, %arg11: memref<1x128xf32, #tpu.memory_space<vmem>>, %arg12: memref<128x128xf32, #tpu.memory_space<vmem>>, %arg13: memref<1x128xf32, #tpu.memory_space<vmem>>, %arg14: memref<1x8x128xf32, #tpu.memory_space<vmem>>, %arg15: memref<1x16x128xf32, #tpu.memory_space<vmem>>, %arg16: memref<16x128xf32, #tpu.memory_space<vmem>>, %arg17: memref<16x128xf32, #tpu.memory_space<vmem>>) attributes {dimension_semantics = [#tpu.dimension_semantics<parallel>, #tpu.dimension_semantics<arbitrary>], iteration_bounds = array<i64: 2, 2>, scalar_prefetch = 0 : i64, scratch_operands = 2 : i64, tpu.core_type = #tpu.core_type<tc>, window_params = [{transform_indices = @transform_0, window_bounds = array<i64: 1, 8, 16, 128>}, {pipeline_mode = #tpu.pipeline_mode<synchronous>, transform_indices = @transform_1, window_bounds = array<i64: 128, 128>}, {pipeline_mode = #tpu.pipeline_mode<synchronous>, transform_indices = @transform_2, window_bounds = array<i64: 1, 128>}, {pipeline_mode = #tpu.pipeline_mode<synchronous>, transform_indices = @transform_3, window_bounds = array<i64: 1, 128>}, {pipeline_mode = #tpu.pipeline_mode<synchronous>, transform_indices = @transform_4, window_bounds = array<i64: 128, 128>}, {pipeline_mode = #tpu.pipeline_mode<synchronous>, transform_indices = @transform_5, window_bounds = array<i64: 1, 128>}, {pipeline_mode = #tpu.pipeline_mode<synchronous>, transform_indices = @transform_6, window_bounds = array<i64: 128, 128>}, {pipeline_mode = #tpu.pipeline_mode<synchronous>, transform_indices = @transform_7, window_bounds = array<i64: 1, 128>}, {pipeline_mode = #tpu.pipeline_mode<synchronous>, transform_indices = @transform_8, window_bounds = array<i64: 128, 128>}, {pipeline_mode = #tpu.pipeline_mode<synchronous>, transform_indices = @transform_9, window_bounds = array<i64: 1, 128>}, {pipeline_mode = #tpu.pipeline_mode<synchronous>, transform_indices = @transform_10, window_bounds = array<i64: 128, 128>}, {pipeline_mode = #tpu.pipeline_mode<synchronous>, transform_indices = @transform_11, window_bounds = array<i64: 1, 128>}, {transform_indices = @transform_12, window_bounds = array<i64: 1, 8, 128>}, {transform_indices = @transform_13, window_bounds = array<i64: 1, 16, 128>}]} {
    %c0 = arith.constant 0 : index
    %c0_0 = arith.constant 0 : index
    %c0_1 = arith.constant 0 : index
    %c0_2 = arith.constant 0 : index
    %0 = vector.load %arg2[%c0, %c0_0, %c0_1, %c0_2] : memref<1x8x16x128xf32, #tpu.memory_space<vmem>>, vector<1x8x16x128xf32>
    %1 = vector.shape_cast %0 : vector<1x8x16x128xf32> to vector<8x16x128xf32>
    %cst = arith.constant dense<0.000000e+00> : vector<8x128xf32>
    %2 = vector.multi_reduction <add>, %1, %cst [1] : vector<8x16x128xf32> to vector<8x128xf32>
    %cst_3 = arith.constant 6.250000e-02 : f32
    %3 = vector.broadcast %cst_3 : f32 to vector<8x128xf32>
    %4 = arith.mulf %2, %3 : vector<8x128xf32>
    %c0_4 = arith.constant 0 : index
    %c0_5 = arith.constant 0 : index
    %5 = vector.load %arg3[%c0_4, %c0_5] : memref<128x128xf32, #tpu.memory_space<vmem>>, vector<128x128xf32>
    %cst_6 = arith.constant dense<0.000000e+00> : vector<8x128xf32>
    %6 = tpu.matmul %4, %5, %cst_6 {dimension_numbers = #tpu.dot_dimension_numbers<[1], [0], [0], [1], [0, 0, 1, 1], [], []>} : vector<8x128xf32>, vector<128x128xf32>, vector<8x128xf32> -> vector<8x128xf32>
    %c0_7 = arith.constant 0 : index
    %c0_8 = arith.constant 0 : index
    %7 = vector.load %arg4[%c0_7, %c0_8] : memref<1x128xf32, #tpu.memory_space<vmem>>, vector<1x128xf32>
    %8 = vector.broadcast %7 : vector<1x128xf32> to vector<8x128xf32>
    %9 = arith.mulf %6, %8 : vector<8x128xf32>
    %c0_9 = arith.constant 0 : index
    %c0_10 = arith.constant 0 : index
    %10 = vector.load %arg5[%c0_9, %c0_10] : memref<1x128xf32, #tpu.memory_space<vmem>>, vector<1x128xf32>
    %11 = vector.broadcast %10 : vector<1x128xf32> to vector<8x128xf32>
    %12 = arith.addf %9, %11 : vector<8x128xf32>
    %cst_11 = arith.constant 3.000000e+00 : f32
    %13 = vector.broadcast %cst_11 : f32 to vector<8x128xf32>
    %14 = arith.addf %12, %13 : vector<8x128xf32>
    %cst_12 = arith.constant 0.000000e+00 : f32
    %cst_13 = arith.constant 6.000000e+00 : f32
    %15 = vector.broadcast %cst_12 : f32 to vector<8x128xf32>
    %16 = arith.maximumf %15, %14 : vector<8x128xf32>
    %17 = vector.broadcast %cst_13 : f32 to vector<8x128xf32>
    %18 = arith.minimumf %17, %16 : vector<8x128xf32>
    %19 = arith.mulf %12, %18 : vector<8x128xf32>
    %cst_14 = arith.constant 0.166666672 : f32
    %20 = vector.broadcast %cst_14 : f32 to vector<8x128xf32>
    %21 = arith.mulf %19, %20 : vector<8x128xf32>
    %c0_15 = arith.constant 0 : index
    %c0_16 = arith.constant 0 : index
    %22 = vector.load %arg6[%c0_15, %c0_16] : memref<128x128xf32, #tpu.memory_space<vmem>>, vector<128x128xf32>
    %cst_17 = arith.constant dense<0.000000e+00> : vector<8x128xf32>
    %23 = tpu.matmul %21, %22, %cst_17 {dimension_numbers = #tpu.dot_dimension_numbers<[1], [0], [0], [1], [0, 0, 1, 1], [], []>} : vector<8x128xf32>, vector<128x128xf32>, vector<8x128xf32> -> vector<8x128xf32>
    %c0_18 = arith.constant 0 : index
    %c0_19 = arith.constant 0 : index
    %24 = vector.load %arg7[%c0_18, %c0_19] : memref<1x128xf32, #tpu.memory_space<vmem>>, vector<1x128xf32>
    %25 = vector.broadcast %24 : vector<1x128xf32> to vector<8x128xf32>
    %26 = arith.addf %23, %25 : vector<8x128xf32>
    %cst_20 = arith.constant 0.000000e+00 : f32
    %27 = vector.broadcast %cst_20 : f32 to vector<8x128xf32>
    %28 = arith.subf %27, %26 : vector<8x128xf32>
    %29 = math.exp %28 : vector<8x128xf32>
    %cst_21 = arith.constant 1.000000e+00 : f32
    %30 = vector.broadcast %cst_21 : f32 to vector<8x128xf32>
    %31 = arith.addf %30, %29 : vector<8x128xf32>
    %cst_22 = arith.constant 1.000000e+00 : f32
    %32 = vector.broadcast %cst_22 : f32 to vector<8x128xf32>
    %33 = arith.divf %32, %31 : vector<8x128xf32>
    %c0_23 = arith.constant 0 : index
    %c0_24 = arith.constant 0 : index
    %c0_25 = arith.constant 0 : index
    %34 = vector.load %arg14[%c0_23, %c0_24, %c0_25] : memref<1x8x128xf32, #tpu.memory_space<vmem>>, vector<1x8x128xf32>
    %35 = vector.shape_cast %34 : vector<1x8x128xf32> to vector<8x128xf32>
    %36 = vector.shape_cast %33 : vector<8x128xf32> to vector<1x8x128xf32>
    tpu.vector_store %arg14[%c0_23, %c0_24, %c0_25], %36 {strides = array<i32>} : memref<1x8x128xf32, #tpu.memory_space<vmem>>, vector<1x8x128xf32>,
    %c0_i32 = arith.constant 0 : i32
    %37 = arith.cmpi eq, %arg1, %c0_i32 : i32
    %38 = arith.extui %37 : i1 to i32
    %c0_i32_26 = arith.constant 0 : i32
    %39 = arith.cmpi ne, %38, %c0_i32_26 : i32
    scf.if %39 {
      %cst_39 = arith.constant 0.000000e+00 : f32
      %56 = vector.broadcast %cst_39 : f32 to vector<16x128xf32>
      %c0_40 = arith.constant 0 : index
      %c0_41 = arith.constant 0 : index
      %57 = vector.load %arg16[%c0_40, %c0_41] : memref<16x128xf32, #tpu.memory_space<vmem>>, vector<16x128xf32>
      tpu.vector_store %arg16[%c0_40, %c0_41], %56 {strides = array<i32>} : memref<16x128xf32, #tpu.memory_space<vmem>>, vector<16x128xf32>,
      %cst_42 = arith.constant 0.000000e+00 : f32
      %58 = vector.broadcast %cst_42 : f32 to vector<16x128xf32>
      %c0_43 = arith.constant 0 : index
      %c0_44 = arith.constant 0 : index
      %59 = vector.load %arg17[%c0_43, %c0_44] : memref<16x128xf32, #tpu.memory_space<vmem>>, vector<16x128xf32>
      tpu.vector_store %arg17[%c0_43, %c0_44], %58 {strides = array<i32>} : memref<16x128xf32, #tpu.memory_space<vmem>>, vector<16x128xf32>,
    } else {
    }
    %c0_27 = arith.constant 0 : index
    %c0_28 = arith.constant 0 : index
    %40 = vector.load %arg16[%c0_27, %c0_28] : memref<16x128xf32, #tpu.memory_space<vmem>>, vector<16x128xf32>
    %cst_29 = arith.constant dense<0.000000e+00> : vector<16x128xf32>
    %41 = vector.multi_reduction <add>, %1, %cst_29 [0] : vector<8x16x128xf32> to vector<16x128xf32>
    %cst_30 = arith.constant 6.250000e-02 : f32
    %42 = vector.broadcast %cst_30 : f32 to vector<16x128xf32>
    %43 = arith.mulf %41, %42 : vector<16x128xf32>
    %44 = arith.addf %40, %43 : vector<16x128xf32>
    %c0_31 = arith.constant 0 : index
    %c0_32 = arith.constant 0 : index
    %45 = vector.load %arg16[%c0_31, %c0_32] : memref<16x128xf32, #tpu.memory_space<vmem>>, vector<16x128xf32>
    tpu.vector_store %arg16[%c0_31, %c0_32], %44 {strides = array<i32>} : memref<16x128xf32, #tpu.memory_space<vmem>>, vector<16x128xf32>,
    %c0_33 = arith.constant 0 : index
    %c0_34 = arith.constant 0 : index
    %46 = vector.load %arg17[%c0_33, %c0_34] : memref<16x128xf32, #tpu.memory_space<vmem>>, vector<16x128xf32>
    %47 = vector.shape_cast %33 : vector<8x128xf32> to vector<8x1x128xf32>
    %48 = vector.broadcast %47 : vector<8x1x128xf32> to vector<8x16x128xf32>
    %49 = arith.mulf %1, %48 : vector<8x16x128xf32>
    %cst_35 = arith.constant dense<0.000000e+00> : vector<16x128xf32>
    %50 = vector.multi_reduction <add>, %49, %cst_35 [0] : vector<8x16x128xf32> to vector<16x128xf32>
    %51 = arith.addf %46, %50 : vector<16x128xf32>
    %c0_36 = arith.constant 0 : index
    %c0_37 = arith.constant 0 : index
    %52 = vector.load %arg17[%c0_36, %c0_37] : memref<16x128xf32, #tpu.memory_space<vmem>>, vector<16x128xf32>
    tpu.vector_store %arg17[%c0_36, %c0_37], %51 {strides = array<i32>} : memref<16x128xf32, #tpu.memory_space<vmem>>, vector<16x128xf32>,
    %c1_i32 = arith.constant 1 : i32
    %53 = arith.cmpi eq, %arg1, %c1_i32 : i32
    %54 = arith.extui %53 : i1 to i32
    %c0_i32_38 = arith.constant 0 : i32
    %55 = arith.cmpi ne, %54, %c0_i32_38 : i32
    scf.if %55 {
      %c0_39 = arith.constant 0 : index
      %c0_40 = arith.constant 0 : index
      %56 = vector.load %arg16[%c0_39, %c0_40] : memref<16x128xf32, #tpu.memory_space<vmem>>, vector<16x128xf32>
      %c0_41 = arith.constant 0 : index
      %c0_42 = arith.constant 0 : index
      %57 = vector.load %arg3[%c0_41, %c0_42] : memref<128x128xf32, #tpu.memory_space<vmem>>, vector<128x128xf32>
      %cst_43 = arith.constant dense<0.000000e+00> : vector<16x128xf32>
      %58 = tpu.matmul %56, %57, %cst_43 {dimension_numbers = #tpu.dot_dimension_numbers<[1], [0], [0], [1], [0, 0, 1, 1], [], []>} : vector<16x128xf32>, vector<128x128xf32>, vector<16x128xf32> -> vector<16x128xf32>
      %c0_44 = arith.constant 0 : index
      %c0_45 = arith.constant 0 : index
      %59 = vector.load %arg4[%c0_44, %c0_45] : memref<1x128xf32, #tpu.memory_space<vmem>>, vector<1x128xf32>
      %60 = vector.broadcast %59 : vector<1x128xf32> to vector<16x128xf32>
      %61 = arith.mulf %58, %60 : vector<16x128xf32>
      %c0_46 = arith.constant 0 : index
      %c0_47 = arith.constant 0 : index
      %62 = vector.load %arg5[%c0_46, %c0_47] : memref<1x128xf32, #tpu.memory_space<vmem>>, vector<1x128xf32>
      %63 = vector.broadcast %62 : vector<1x128xf32> to vector<16x128xf32>
      %64 = arith.addf %61, %63 : vector<16x128xf32>
      %cst_48 = arith.constant 3.000000e+00 : f32
      %65 = vector.broadcast %cst_48 : f32 to vector<16x128xf32>
      %66 = arith.addf %64, %65 : vector<16x128xf32>
      %cst_49 = arith.constant 0.000000e+00 : f32
      %cst_50 = arith.constant 6.000000e+00 : f32
      %67 = vector.broadcast %cst_49 : f32 to vector<16x128xf32>
      %68 = arith.maximumf %67, %66 : vector<16x128xf32>
      %69 = vector.broadcast %cst_50 : f32 to vector<16x128xf32>
      %70 = arith.minimumf %69, %68 : vector<16x128xf32>
      %71 = arith.mulf %64, %70 : vector<16x128xf32>
      %cst_51 = arith.constant 0.166666672 : f32
      %72 = vector.broadcast %cst_51 : f32 to vector<16x128xf32>
      %73 = arith.mulf %71, %72 : vector<16x128xf32>
      %c0_52 = arith.constant 0 : index
      %c0_53 = arith.constant 0 : index
      %74 = vector.load %arg8[%c0_52, %c0_53] : memref<128x128xf32, #tpu.memory_space<vmem>>, vector<128x128xf32>
      %cst_54 = arith.constant dense<0.000000e+00> : vector<16x128xf32>
      %75 = tpu.matmul %73, %74, %cst_54 {dimension_numbers = #tpu.dot_dimension_numbers<[1], [0], [0], [1], [0, 0, 1, 1], [], []>} : vector<16x128xf32>, vector<128x128xf32>, vector<16x128xf32> -> vector<16x128xf32>
      %c0_55 = arith.constant 0 : index
      %c0_56 = arith.constant 0 : index
      %76 = vector.load %arg9[%c0_55, %c0_56] : memref<1x128xf32, #tpu.memory_space<vmem>>, vector<1x128xf32>
      %77 = vector.broadcast %76 : vector<1x128xf32> to vector<16x128xf32>
      %78 = arith.addf %75, %77 : vector<16x128xf32>
      %cst_57 = arith.constant 0.000000e+00 : f32
      %79 = vector.broadcast %cst_57 : f32 to vector<16x128xf32>
      %80 = arith.subf %79, %78 : vector<16x128xf32>
      %81 = math.exp %80 : vector<16x128xf32>
      %cst_58 = arith.constant 1.000000e+00 : f32
      %82 = vector.broadcast %cst_58 : f32 to vector<16x128xf32>
      %83 = arith.addf %82, %81 : vector<16x128xf32>
      %cst_59 = arith.constant 1.000000e+00 : f32
      %84 = vector.broadcast %cst_59 : f32 to vector<16x128xf32>
      %85 = arith.divf %84, %83 : vector<16x128xf32>
      %c0_60 = arith.constant 0 : index
      %c0_61 = arith.constant 0 : index
      %86 = vector.load %arg17[%c0_60, %c0_61] : memref<16x128xf32, #tpu.memory_space<vmem>>, vector<16x128xf32>
      %87 = arith.mulf %85, %86 : vector<16x128xf32>
      %cst_62 = arith.constant dense<0.000000e+00> : vector<128xf32>
      %88 = vector.multi_reduction <add>, %87, %cst_62 [0] : vector<16x128xf32> to vector<128xf32>
      %89 = vector.shape_cast %88 : vector<128xf32> to vector<1x128xf32>
      %cst_63 = arith.constant 3.906250e-03 : f32
      %90 = vector.broadcast %cst_63 : f32 to vector<1x128xf32>
      %91 = arith.mulf %89, %90 : vector<1x128xf32>
      %c0_64 = arith.constant 0 : index
      %c0_65 = arith.constant 0 : index
      %92 = vector.load %arg10[%c0_64, %c0_65] : memref<128x128xf32, #tpu.memory_space<vmem>>, vector<128x128xf32>
      %cst_66 = arith.constant dense<0.000000e+00> : vector<1x128xf32>
      %93 = tpu.matmul %91, %92, %cst_66 {dimension_numbers = #tpu.dot_dimension_numbers<[1], [0], [0], [1], [0, 0, 1, 1], [], []>} : vector<1x128xf32>, vector<128x128xf32>, vector<1x128xf32> -> vector<1x128xf32>
      %c0_67 = arith.constant 0 : index
      %c0_68 = arith.constant 0 : index
      %94 = vector.load %arg11[%c0_67, %c0_68] : memref<1x128xf32, #tpu.memory_space<vmem>>, vector<1x128xf32>
      %95 = arith.addf %93, %94 : vector<1x128xf32>
      %cst_69 = arith.constant 0.000000e+00 : f32
      %96 = vector.broadcast %cst_69 : f32 to vector<1x128xf32>
      %97 = arith.maximumf %95, %96 : vector<1x128xf32>
      %c0_70 = arith.constant 0 : index
      %c0_71 = arith.constant 0 : index
      %98 = vector.load %arg12[%c0_70, %c0_71] : memref<128x128xf32, #tpu.memory_space<vmem>>, vector<128x128xf32>
      %cst_72 = arith.constant dense<0.000000e+00> : vector<1x128xf32>
      %99 = tpu.matmul %97, %98, %cst_72 {dimension_numbers = #tpu.dot_dimension_numbers<[1], [0], [0], [1], [0, 0, 1, 1], [], []>} : vector<1x128xf32>, vector<128x128xf32>, vector<1x128xf32> -> vector<1x128xf32>
      %c0_73 = arith.constant 0 : index
      %c0_74 = arith.constant 0 : index
      %100 = vector.load %arg13[%c0_73, %c0_74] : memref<1x128xf32, #tpu.memory_space<vmem>>, vector<1x128xf32>
      %101 = arith.addf %99, %100 : vector<1x128xf32>
      %cst_75 = arith.constant 0.000000e+00 : f32
      %102 = vector.broadcast %cst_75 : f32 to vector<1x128xf32>
      %103 = arith.subf %102, %101 : vector<1x128xf32>
      %104 = math.exp %103 : vector<1x128xf32>
      %cst_76 = arith.constant 1.000000e+00 : f32
      %105 = vector.broadcast %cst_76 : f32 to vector<1x128xf32>
      %106 = arith.addf %105, %104 : vector<1x128xf32>
      %cst_77 = arith.constant 1.000000e+00 : f32
      %107 = vector.broadcast %cst_77 : f32 to vector<1x128xf32>
      %108 = arith.divf %107, %106 : vector<1x128xf32>
      %109 = vector.broadcast %108 : vector<1x128xf32> to vector<16x128xf32>
      %110 = arith.mulf %85, %109 : vector<16x128xf32>
      %c0_78 = arith.constant 0 : index
      %c0_79 = arith.constant 0 : index
      %c0_80 = arith.constant 0 : index
      %111 = vector.load %arg15[%c0_78, %c0_79, %c0_80] : memref<1x16x128xf32, #tpu.memory_space<vmem>>, vector<1x16x128xf32>
      %112 = vector.shape_cast %111 : vector<1x16x128xf32> to vector<16x128xf32>
      %113 = vector.shape_cast %110 : vector<16x128xf32> to vector<1x16x128xf32>
      tpu.vector_store %arg15[%c0_78, %c0_79, %c0_80], %113 {strides = array<i32>} : memref<1x16x128xf32, #tpu.memory_space<vmem>>, vector<1x16x128xf32>,
    } else {
    }
    return
  }
  func.func @transform_0(%arg0: i32, %arg1: i32) -> (i32, i32, i32, i32) {
    %c0_i32 = arith.constant 0 : i32
    %c0_i32_0 = arith.constant 0 : i32
    %c0_i32_1 = arith.constant 0 : i32
    return %arg0, %arg1, %c0_i32, %c0_i32_0 : i32, i32, i32, i32
  }
  func.func @transform_1(%arg0: i32, %arg1: i32) -> (i32, i32) {
    %c0_i32 = arith.constant 0 : i32
    %c0_i32_0 = arith.constant 0 : i32
    %c0_i32_1 = arith.constant 0 : i32
    return %c0_i32, %c0_i32_0 : i32, i32
  }
  func.func @transform_2(%arg0: i32, %arg1: i32) -> (i32, i32) {
    %c0_i32 = arith.constant 0 : i32
    %c0_i32_0 = arith.constant 0 : i32
    %c0_i32_1 = arith.constant 0 : i32
    return %c0_i32, %c0_i32_0 : i32, i32
  }
  func.func @transform_3(%arg0: i32, %arg1: i32) -> (i32, i32) {
    %c0_i32 = arith.constant 0 : i32
    %c0_i32_0 = arith.constant 0 : i32
    %c0_i32_1 = arith.constant 0 : i32
    return %c0_i32, %c0_i32_0 : i32, i32
  }
  func.func @transform_4(%arg0: i32, %arg1: i32) -> (i32, i32) {
    %c0_i32 = arith.constant 0 : i32
    %c0_i32_0 = arith.constant 0 : i32
    %c0_i32_1 = arith.constant 0 : i32
    return %c0_i32, %c0_i32_0 : i32, i32
  }
  func.func @transform_5(%arg0: i32, %arg1: i32) -> (i32, i32) {
    %c0_i32 = arith.constant 0 : i32
    %c0_i32_0 = arith.constant 0 : i32
    %c0_i32_1 = arith.constant 0 : i32
    return %c0_i32, %c0_i32_0 : i32, i32
  }
  func.func @transform_6(%arg0: i32, %arg1: i32) -> (i32, i32) {
    %c0_i32 = arith.constant 0 : i32
    %c0_i32_0 = arith.constant 0 : i32
    %c0_i32_1 = arith.constant 0 : i32
    return %c0_i32, %c0_i32_0 : i32, i32
  }
  func.func @transform_7(%arg0: i32, %arg1: i32) -> (i32, i32) {
    %c0_i32 = arith.constant 0 : i32
    %c0_i32_0 = arith.constant 0 : i32
    %c0_i32_1 = arith.constant 0 : i32
    return %c0_i32, %c0_i32_0 : i32, i32
  }
  func.func @transform_8(%arg0: i32, %arg1: i32) -> (i32, i32) {
    %c0_i32 = arith.constant 0 : i32
    %c0_i32_0 = arith.constant 0 : i32
    %c0_i32_1 = arith.constant 0 : i32
    return %c0_i32, %c0_i32_0 : i32, i32
  }
  func.func @transform_9(%arg0: i32, %arg1: i32) -> (i32, i32) {
    %c0_i32 = arith.constant 0 : i32
    %c0_i32_0 = arith.constant 0 : i32
    %c0_i32_1 = arith.constant 0 : i32
    return %c0_i32, %c0_i32_0 : i32, i32
  }
  func.func @transform_10(%arg0: i32, %arg1: i32) -> (i32, i32) {
    %c0_i32 = arith.constant 0 : i32
    %c0_i32_0 = arith.constant 0 : i32
    %c0_i32_1 = arith.constant 0 : i32
    return %c0_i32, %c0_i32_0 : i32, i32
  }
  func.func @transform_11(%arg0: i32, %arg1: i32) -> (i32, i32) {
    %c0_i32 = arith.constant 0 : i32
    %c0_i32_0 = arith.constant 0 : i32
    %c0_i32_1 = arith.constant 0 : i32
    return %c0_i32, %c0_i32_0 : i32, i32
  }
  func.func @transform_12(%arg0: i32, %arg1: i32) -> (i32, i32, i32) {
    %c0_i32 = arith.constant 0 : i32
    %c0_i32_0 = arith.constant 0 : i32
    return %arg0, %arg1, %c0_i32 : i32, i32, i32
  }
  func.func @transform_13(%arg0: i32, %arg1: i32) -> (i32, i32, i32) {
    %c0_i32 = arith.constant 0 : i32
    %c0_i32_0 = arith.constant 0 : i32
    %c0_i32_1 = arith.constant 0 : i32
    return %arg0, %c0_i32, %c0_i32_0 : i32, i32, i32
  }
}

</mosaic_0001>

<bundles_post_ra>
// kernel: tpu_custom_call.1
= control target key start
LH: loop header
LB: loop body
LE: loop exit
PB: predicated region body
PF: predicated region fallthrough
CT: control target
= control target key end

     0   :  { %s3460_s0 = inlined_call_operand.hbm [shape: f32[2,16,16,128], index: 0, kind: input, shape index: {}]   ;;  %s3461_s1 = inlined_call_operand.hbm [shape: f32[128,128], index: 1, kind: input, shape index: {}]   ;;  %s3462_s2 = inlined_call_operand.vmem [shape: f32[1,128], index: 2, kind: input, shape index: {}]   ;;  %s3463_s3 = inlined_call_operand.vmem [shape: f32[1,128], index: 3, kind: input, shape index: {}]   ;;  %s3464_s4 = inlined_call_operand.hbm [shape: f32[128,128], index: 4, kind: input, shape index: {}]   ;;  %s3465_s5 = inlined_call_operand.vmem [shape: f32[1,128], index: 5, kind: input, shape index: {}]   ;;  %s3466_s6 = inlined_call_operand.hbm [shape: f32[128,128], index: 6, kind: input, shape index: {}]   ;;  %s3467_s7 = inlined_call_operand.vmem [shape: f32[1,128], index: 7, kind: input, shape index: {}]   ;;  %s3468_s8 = inlined_call_operand.hbm [shape: f32[128,128], index: 8, kind: input, shape index: {}]   ;;  %s3469_s9 = inlined_call_operand.vmem [shape: f32[1,128], index: 9, kind: input, shape index: {}]   ;;  %s3470_s10 = inlined_call_operand.hbm [shape: f32[128,128], index: 10, kind: input, shape index: {}]   ;;  %s3471_s11 = inlined_call_operand.vmem [shape: f32[1,128], index: 11, kind: input, shape index: {}]   ;;  %s3472_s12 = inlined_call_operand.hbm [shape: f32[2,16,128], index: 12, kind: output, shape index: {0}]   ;;  %s3473_s13 = inlined_call_operand.hbm [shape: f32[2,16,128], index: 13, kind: output, shape index: {1}]  }
   0x1   :  { %3492 = sst [smem:[#allocation30_spill]] %s3460_s0 }
   0x2   :  { %3493 = sst [smem:[#allocation31_spill]] %s3461_s1 }
   0x3   :  { %3494 = sst [smem:[#allocation32_spill]] %s3462_s2 }
   0x4   :  { %3495 = sst [smem:[#allocation33_spill]] %s3463_s3 }
   0x5   :  { %3496 = sst [smem:[#allocation34_spill]] %s3464_s4 }
   0x6   :  { %3497 = sst [smem:[#allocation35_spill]] %s3465_s5 }
   0x7   :  { %3498 = sst [smem:[#allocation36_spill]] %s3466_s6 }
   0x8   :  { %3499 = sst [smem:[#allocation37_spill]] %s3467_s7 }
   0x9   :  { %3500 = sst [smem:[#allocation38_spill]] %s3468_s8 }
   0xa   :  { %3501 = sst [smem:[#allocation39_spill]] %s3469_s9 }
   0xb   :  { %3502 = sst [smem:[#allocation40_spill]] %s3470_s10 }
   0xc   :  { %3503 = sst [smem:[#allocation41_spill]] %s3471_s11 }
   0xd   :  { %3504 = sst [smem:[#allocation42_spill]] %s3472_s12 }
   0xe   :  { %3505 = sst [smem:[#allocation43_spill]] %s3473_s13 }
   0xf   :  { %19 = vsyncpa [#allocation5], 0 }
  0x10   :  { %21 = vsyncpa [#allocation5 + $0x1], 0 }
  0x11   :  { %22 = vsyncpa [#allocation8], 0 }
  0x12   :  { %23 = vsyncpa [#allocation11], 0 }
  0x13   :  { %24 = vsyncpa [#allocation14], 0 }
  0x14   :  { %25 = vsyncpa [#allocation6], 0 }
  0x15   :  { %27 = vsyncpa [#allocation6 + $0x1], 0 }
  0x16   :  { %28 = vsyncpa [#allocation17], 0 }
  0x17   :  { %30 = vsyncpa [#allocation17 + $0x1], 0  ;;  %s2797_s25 = smov 0   ;;  %s2799_s26 = smov 0  }
  0x18   :  { %s2801_s27 = smov 0   ;;  %s2803_s28 = smov 0  }
  0x19   :  { %s2805_s29 = smov 0   ;;  %s2807_s30 = smov 0  }
  0x1a   :  { %s2809_s14 = smov 0   ;;  %s2811_s15 = smov 0  }
  0x1b   :  { %s2813_s16 = smov 0   ;;  %s2815_s17 = smov 0  }
  0x1c   :  { %s2817_s18 = smov 0  }
  0x1d LB: > { %3506 = sst [smem:[#allocation24_spill]] %s2689_s14  ;;  %s3474_s19 = sadd.s32 4294967295, %s2705_s18   ;;  %s2705_s18 = sphi %s2817_s18, %s36_s18   ;;  %s2701_s17 = sphi %s2815_s17, %s3559_s17   ;;  %s2697_s16 = sphi %s2813_s16, %s3567_s16   ;;  %s2693_s15 = sphi %s2811_s15, %s3557_s15   ;;  %s2689_s14 = sphi %s2809_s14, %s3566_s14   ;;  %s2685_s30 = sphi %s2807_s30, %s3565_s30   ;;  %s2681_s29 = sphi %s2805_s29, %s3564_s29   ;;  %s2677_s28 = sphi %s2803_s28, %s3563_s28   ;;  %s2673_s27 = sphi %s2801_s27, %s3562_s27   ;;  %s2669_s26 = sphi %s2799_s26, %s3561_s26   ;;  %s2665_s25 = sphi %s2797_s25, %s3560_s25  }
  0x1e   : > { %3507 = sst [smem:[#allocation25_spill]] %s2693_s15  ;;  %p1670_p0 = scmp.ge.s32.totalorder %s2705_s18, 1 }
  0x1f   : > { %3508 = sst [smem:[#allocation26_spill]] %s2701_s17  ;;  %p2856_p1 = scmp.eq.s32.totalorder %s3474_s19, 0 }
  0x20   : > { %p366_p2 = scmp.lt.s32.totalorder %s2705_s18, 5  ;;  %s2707_s22 = smov [#allocation7]  }
  0x21   : > { %s3509_s20 = scalar_select %p2856_p1, 1, 0 }
  0x22   : > { %p2861_p3 = pnand %p1670_p0, %p366_p2  ;;  %s378_s23 = sshll.u32 %s2707_s22, 4  ;;  %s2865_s23 = int_to_ptr.vmem [resolvable:$true] %s378_s23 }
  0x23   : > { %s2708_s19 = smov [#allocation10]   ;;  %s2709_s12 = smov [#allocation9]  }
  0x24   : > { %s3510_s21 = scalar_select %p2861_p3, 1, 0 }
  0x25   : > { %p2209_p4 = pneg %p2861_p3  ;;  %s413_s13 = sshll.u32 %s2708_s19, 4  ;;  %s2875_s13 = int_to_ptr.vmem [resolvable:$true] %s413_s13 }
  0x26   : > { %3511 = sst [smem:[#allocation27_spill]] %s3510_s21  ;;  %s2877_s15 = sshll.u32 %s2709_s12, 4  ;;  %s398_s15 = int_to_ptr.vmem [resolvable:$true] %s2877_s15 }
  0x27   : > { %p2871_p5 = pnand %p2209_p4, %p2856_p1  ;;  %s3513_s1 = sld [smem:[#allocation31_spill]] }
  0x29   : > { %p2887_p7 = pneg %p2871_p5 }
  0x2d   : > { %s2369_s22 = scalar_lea.hbm %s3513_s1, 2048 }
  0x2e   : > { %p2370_p6 = scmp.ne.s32.totalorder %s3513_s1, %s2369_s22  ;;  %p2376_p10 = scmp.lt.u32.totalorder %s2369_s22, %s3513_s1 }
  0x30   : > { %p2372_p8 = pnand %p2887_p7, %p2370_p6 }
  0x32   : > { %p2373_p9 = pneg %p2372_p8 }
  0x34   : > { %p2378_p11 = pnand %p2376_p10, %p2373_p9 }
  0x36   : > { %2381 = shalt.err (!%p2378_p11)
}
  0x37   : > { %s2382_s7 = scalar_lea.vmem %s2865_s23, 2048  ;;  %p2390_p2 = scmp.lt.s32.totalorder %s2865_s23, %s2865_s23 }
  0x38   : > { %p2383_p12 = scmp.ne.s32.totalorder %s2865_s23, %s2382_s7  ;;  %p2391_p4 = scmp.lt.s32.totalorder %s2382_s7, %s2382_s7 }
  0x3a   : > { %p2385_p13 = pnand %p2383_p12, %p2887_p7  ;;  %p2392_p6 = por %p2391_p4, %p2390_p2 }
  0x3c   : > { %p2386_p0 = pneg %p2385_p13 }
  0x3e   : > { %p2393_p8 = pnand %p2392_p6, %p2386_p0 }
  0x40   : > { %2396 = shalt.err (!%p2393_p8)
}
  0x41   : > { %s3483_s9 = smov 128   ;;  %s3484_s11 = smov 8  }
  0x42   : > { %2212 = dma.hbm_to_vmem [thread:$0]  (!%p2871_p5), %s3513_s1, 2048, %s2865_s23, [#allocation8], %s3483_s9, %s3483_s9, %s3484_s11  }
  0x43   : > { %s3515_s6 = sld [smem:[#allocation36_spill]] }
  0x49   : > { %s2397_s7 = scalar_lea.hbm %s3515_s6, 2048 }
  0x4a   : > { %p2398_p9 = scmp.ne.s32.totalorder %s3515_s6, %s2397_s7  ;;  %p2404_p12 = scmp.lt.u32.totalorder %s2397_s7, %s3515_s6 }
  0x4c   : > { %p2400_p10 = pnand %p2398_p9, %p2887_p7 }
  0x4e   : > { %p2401_p11 = pneg %p2400_p10 }
  0x50   : > { %p2406_p13 = pnand %p2404_p12, %p2401_p11 }
  0x52   : > { %2409 = shalt.err (!%p2406_p13)
}
  0x53   : > { %s2410_s23 = scalar_lea.vmem %s2875_s13, 2048  ;;  %p2418_p6 = scmp.lt.s32.totalorder %s2875_s13, %s2875_s13 }
  0x54   : > { %p2411_p0 = scmp.ne.s32.totalorder %s2875_s13, %s2410_s23  ;;  %p2419_p8 = scmp.lt.s32.totalorder %s2410_s23, %s2410_s23 }
  0x56   : > { %p2413_p2 = pnand %p2411_p0, %p2887_p7  ;;  %p2420_p9 = por %p2419_p8, %p2418_p6 }
  0x58   : > { %p2414_p4 = pneg %p2413_p2 }
  0x5a   : > { %p2421_p10 = pnand %p2420_p9, %p2414_p4 }
  0x5c   : > { %2424 = shalt.err (!%p2421_p10)
}
  0x5d   : > { %2218 = dma.hbm_to_vmem [thread:$0]  (!%p2871_p5), %s3515_s6, 2048, %s2875_s13, [#allocation11], %s3483_s9, %s3483_s9, %s3484_s11  }
  0x5e   : > { %s3516_s4 = sld [smem:[#allocation34_spill]] }
  0x64   : > { %s2425_s14 = scalar_lea.hbm %s3516_s4, 2048 }
  0x65   : > { %p2426_p11 = scmp.ne.s32.totalorder %s3516_s4, %s2425_s14  ;;  %p2432_p0 = scmp.lt.u32.totalorder %s2425_s14, %s3516_s4 }
  0x67   : > { %p2428_p12 = pnand %p2426_p11, %p2887_p7 }
  0x69   : > { %p2429_p13 = pneg %p2428_p12 }
  0x6b   : > { %p2434_p2 = pnand %p2432_p0, %p2429_p13 }
  0x6d   : > { %2437 = shalt.err (!%p2434_p2)
}
  0x6e   : > { %s2438_s23 = scalar_lea.vmem %s398_s15, 2048  ;;  %p2446_p9 = scmp.lt.s32.totalorder %s398_s15, %s398_s15 }
  0x6f   : > { %p2439_p4 = scmp.ne.s32.totalorder %s398_s15, %s2438_s23  ;;  %p2447_p10 = scmp.lt.s32.totalorder %s2438_s23, %s2438_s23 }
  0x71   : > { %p2441_p6 = pnand %p2439_p4, %p2887_p7  ;;  %p2448_p3 = por %p2447_p10, %p2446_p9 }
  0x73   : > { %p2442_p8 = pneg %p2441_p6 }
  0x75   : > { %p2449_p1 = pnand %p2448_p3, %p2442_p8 }
  0x77   : > { %2452 = shalt.err (!%p2449_p1)
}
  0x78   : > { %2215 = dma.hbm_to_vmem [thread:$0]  (!%p2871_p5), %s3516_s4, 2048, %s398_s15, [#allocation8], %s3483_s9, %s3483_s9, %s3484_s11  }
  0x79   : > { %s2712_s2 = smov [#allocation12]   ;;  %s2713_s21 = smov [#allocation13]  }
  0x7a   : > { %s429_s3 = sshll.u32 %s2712_s2, 4  ;;  %s445_s14 = sshll.u32 %s2713_s21, 4  ;;  %s430_s3 = int_to_ptr.vmem [resolvable:$true] %s429_s3  ;;  %s446_s14 = int_to_ptr.vmem [resolvable:$true] %s445_s14 }
  0x7b   : > { %s3517_s8 = sld [smem:[#allocation38_spill]] }
  0x81   : > { %s2453_s12 = scalar_lea.hbm %s3517_s8, 2048 }
  0x82   : > { %p2454_p1 = scmp.ne.s32.totalorder %s3517_s8, %s2453_s12  ;;  %p2460_p12 = scmp.lt.u32.totalorder %s2453_s12, %s3517_s8 }
  0x84   : > { %p2456_p3 = pnand %p2454_p1, %p2887_p7 }
  0x86   : > { %p2457_p11 = pneg %p2456_p3 }
  0x88   : > { %p2462_p13 = pnand %p2460_p12, %p2457_p11 }
  0x8a   : > { %2465 = shalt.err (!%p2462_p13)
}
  0x8b   : > { %s2466_s15 = scalar_lea.vmem %s430_s3, 2048  ;;  %p2474_p6 = scmp.lt.s32.totalorder %s430_s3, %s430_s3 }
  0x8c   : > { %p2467_p0 = scmp.ne.s32.totalorder %s430_s3, %s2466_s15  ;;  %p2475_p8 = scmp.lt.s32.totalorder %s2466_s15, %s2466_s15 }
  0x8e   : > { %p2469_p2 = pnand %p2467_p0, %p2887_p7  ;;  %p2476_p9 = por %p2475_p8, %p2474_p6 }
  0x90   : > { %p2470_p4 = pneg %p2469_p2 }
  0x92   : > { %p2477_p10 = pnand %p2476_p9, %p2470_p4 }
  0x94   : > { %2480 = shalt.err (!%p2477_p10)
}
  0x95   : > { %2221 = dma.hbm_to_vmem [thread:$0]  (!%p2871_p5), %s3517_s8, 2048, %s430_s3, [#allocation11], %s3483_s9, %s3483_s9, %s3484_s11  }
  0x96   : > { %s3518_s10 = sld [smem:[#allocation40_spill]] }
  0x9c   : > { %s2481_s22 = scalar_lea.hbm %s3518_s10, 2048 }
  0x9d   : > { %p2482_p1 = scmp.ne.s32.totalorder %s3518_s10, %s2481_s22  ;;  %p2488_p12 = scmp.lt.u32.totalorder %s2481_s22, %s3518_s10 }
  0x9f   : > { %p2484_p3 = pnand %p2482_p1, %p2887_p7 }
  0xa1   : > { %p2485_p11 = pneg %p2484_p3 }
  0xa3   : > { %p2490_p13 = pnand %p2488_p12, %p2485_p11 }
  0xa5   : > { %2493 = shalt.err (!%p2490_p13)
}
  0xa6   : > { %s2494_s13 = scalar_lea.vmem %s446_s14, 2048  ;;  %p2502_p6 = scmp.lt.s32.totalorder %s446_s14, %s446_s14 }
  0xa7   : > { %p2495_p0 = scmp.ne.s32.totalorder %s446_s14, %s2494_s13  ;;  %p2503_p8 = scmp.lt.s32.totalorder %s2494_s13, %s2494_s13 }
  0xa9   : > { %p2497_p2 = pnand %p2495_p0, %p2887_p7  ;;  %p2504_p9 = por %p2503_p8, %p2502_p6 }
  0xab   : > { %p2498_p4 = pneg %p2497_p2 }
  0xad   : > { %p2505_p10 = pnand %p2504_p9, %p2498_p4 }
  0xaf   : > { %2508 = shalt.err (!%p2505_p10)
}
  0xb0   : > { %2224 = dma.hbm_to_vmem [thread:$0]  (!%p2871_p5), %s3518_s10, 2048, %s446_s14, [#allocation14], %s3483_s9, %s3483_s9, %s3484_s11  }
  0xb1   : > { %s1669_s5 = sadd.s32 4294967294, %s2705_s18   ;;  %s45_s24 = sadd.s32 1, %s2697_s16 }
  0xb2   : > { %s48_s1 = sadd.s32 1, %s2701_s17  ;;  %p46_p7 = scmp.ge.s32.totalorder %s45_s24, 2 }
  0xb3   : > { %s57_s0 = sadd.s32 1, %s2685_s30  ;;  %p64_p1 = scmp.ne.s32.totalorder %s2685_s30, %s2681_s29 }
  0xb4   : > { %p65_p3 = scmp.eq.s32.totalorder %s2705_s18, 0  ;;  %s3569_s24 = smov (%p46_p7, %s45_s24), 0 }
  0xb5   : > { %3519 = sst [smem:[#allocation28_spill]] %s3569_s24  ;;  %s3571_s1 = smov (!%p46_p7, %s48_s1), %s2701_s17 }
  0xb6   : > { %s53_s2 = ssub.s32 %s2697_s16, %s3569_s24  ;;  %p3013_p11 = por %p65_p3, %p64_p1 }
  0xb7   : > { %p50_p5 = scmp.ge.s32.totalorder %s3571_s1, 2  ;;  %p70_p12 = scmp.ne.s32.totalorder %s2681_s29, %s2677_s28 }
  0xb8   : > { %s3521_s14 = sadd.s32 4294967295, %s2705_s18   ;;  %p3025_p0 = scmp.eq.s32.totalorder %s1669_s5, 3 }
  0xb9   : > { %p3021_p13 = scmp.eq.s32.totalorder %s3521_s14, 3  ;;  %s3573_s1 = smov (%p50_p5, %s3571_s1), 0 }
  0xba   : > { %3524 = sst [smem:[#allocation29_spill]] %s3573_s1  ;;  %p3525_p2 = scmp.ne.s32.totalorder %s3509_s20, 0 }
  0xbb   : > { %p3039_p6 = por %p3021_p13, %p64_p1  ;;  %s52_s23 = ssub.s32 %s2701_s17, %s3573_s1 }
  0xbc   : > { %p3033_p4 = por %p3525_p2, %p70_p12  ;;  %p3047_p8 = por %p3025_p0, %p70_p12 }
  0xbd   : > { %s3527_s7 = scalar_select %p3039_p6, 1, 0 }
  0xbe   : > { %s3528_s13 = scalar_select %p3047_p8, 1, 0 }
  0xbf   : > { %s54_s3 = sor.u32 %s53_s2, %s52_s23  ;;  %p340_p9 = scmp.eq.s32.totalorder %s52_s23, 0 }
  0xc0   : > { %p55_p10 = scmp.eq.s32.totalorder %s54_s3, 0  ;;  %s342_s15 = sadd.s32 1, %s2673_s27 }
  0xc1   : > { %s3053_s5 = scalar_select %p340_p9, %s2673_s27, %s342_s15  }
  0xc2   : > { %s3056_s14 = scalar_select %p55_p10, %s2685_s30, %s57_s0  }
  0xc3   : > { %p352_p7 = scmp.ne.s32.totalorder %s2673_s27, %s2669_s26  ;;  %p358_p1 = scmp.ne.s32.totalorder %s2669_s26, %s2665_s25 }
  0xc4   : > { %p2241_p3 = scmp.lt.s32.totalorder %s2705_s18, 4  ;;  %s462_s9 = sand.u32 1, %s2685_s30  }
  0xc5   : > { %p3066_p5 = por %p352_p7, %p3021_p13  ;;  %p3072_p12 = por %p358_p1, %p3025_p0 }
  0xc6   : > { %s1677_s23 = sshll.u32 %s462_s9, 7  ;;  %s1707_s3 = sshll.u32 %s2697_s16, 4 }
  0xc7   : > { %s3529_s11 = scalar_select %p3066_p5, 1, 0 }
  0xc8   : > { %s3530_s2 = scalar_select %p3072_p12, 1, 0 }
  0xc9   : > { %s1680_s15 = sshll.u32 %s2701_s17, 5  ;;  %s466_s4 = scalar_lea.vmem [#allocation4], %s1677_s23 }
  0xca   : > { %s476_s0 = sshll.u32 %s466_s4, 4  ;;  %s473_s6 = sadd.s32 %s1707_s3, %s1680_s15  ;;  %s3078_s0 = int_to_ptr.vmem [resolvable:$true] %s476_s0 }
  0xcb   : > { %s1681_s8 = sshll.u32 %s473_s6, 7  ;;  %p3082_p2 = pnand %p2241_p3, %p3013_p11 }
  0xcc   : > { %s3532_s1 = sld [smem:[#allocation30_spill]]  ;;  %s3091_s4 = scalar_lea.sflag [#allocation5], %s462_s9 }
  0xcd   : > { %p2511_p11 = pneg %p3082_p2 }
  0xd2   : > { %s3089_s24 = scalar_lea.hbm %s3532_s1, %s1681_s8  ;;  %s2514_s21 = scalar_lea.hbm %s3532_s1, 8192 }
  0xd3   : > { %s2509_s23 = scalar_lea.hbm %s3089_s24, 2048  ;;  %p2515_p10 = scmp.lt.u32.totalorder %s3089_s24, %s3532_s1 }
  0xd4   : > { %p2510_p13 = scmp.ne.s32.totalorder %s3089_s24, %s2509_s23  ;;  %p2516_p7 = scmp.lt.u32.totalorder %s2514_s21, %s2509_s23 }
  0xd5   : > { %p2518_p3 = scmp.lt.u32.totalorder %s2509_s23, %s3089_s24 }
  0xd6   : > { %p2512_p0 = pnand %p2511_p11, %p2510_p13  ;;  %p2517_p1 = por %p2516_p7, %p2515_p10 }
  0xd8   : > { %p2513_p9 = pneg %p2512_p0  ;;  %p2519_p12 = por %p2518_p3, %p2517_p1 }
  0xda   : > { %p2520_p8 = pnand %p2519_p12, %p2513_p9 }
  0xdc   : > { %2523 = shalt.err (!%p2520_p8)
}
  0xdd   : > { %s2524_s9 = scalar_lea.vmem %s3078_s0, 2048  ;;  %s2714_s15 = smov [#allocation4]  }
  0xde   : > { %p2525_p13 = scmp.ne.s32.totalorder %s3078_s0, %s2524_s9  ;;  %s2529_s19 = sshll.u32 %s2714_s15, 4  ;;  %s2530_s19 = int_to_ptr.vmem [resolvable:$false] %s2529_s19 }
  0xdf   : > { %s2531_s6 = scalar_lea.vmem %s2530_s19, 4096  ;;  %p2532_p6 = scmp.lt.s32.totalorder %s3078_s0, %s2530_s19 }
  0xe0   : > { %p2527_p0 = pnand %p2525_p13, %p2511_p11  ;;  %p2533_p10 = scmp.lt.s32.totalorder %s2531_s6, %s2524_s9 }
  0xe2   : > { %p2528_p5 = pneg %p2527_p0  ;;  %p2534_p7 = por %p2533_p10, %p2532_p6 }
  0xe4   : > { %p2535_p1 = pnand %p2534_p7, %p2528_p5 }
  0xe6   : > { %2538 = shalt.err (!%p2535_p1)
}
  0xe7   : > { %s3533_s23 = smov 8   ;;  %s3534_s10 = smov 128  }
  0xe8   : > { %2228 = dma.hbm_to_vmem [thread:$0]  (!%p3082_p2), %s3089_s24, 2048, %s3078_s0, %s3091_s4, %s3534_s10, %s3534_s10, %s3533_s23  }
  0xe9   : > { %s3535_s21 = sld [smem:[#allocation27_spill]] }
  0xef   : > { %p3536_p8 = scmp.ne.s32.totalorder %s3535_s21, 0 }
  0xf0   : > { %s3125_s8 = sand.u32 (!%p3536_p8), 1, %s2681_s29  }
  0xf1   : > { %488 = sbr.rel (%p3536_p8) target bundleno = 1823 (0x71f), region = 68  ;;  %s1683_s3 = sshll.u32 (!%p3536_p8), %s3125_s8, 7 }
  0xf2   : > { %s491_s9 = scalar_lea.sflag (!%p3536_p8), [#allocation5], %s3125_s8  ;;  %s3129_s15 = scalar_lea.vmem (!%p3536_p8), [#allocation4], %s1683_s3 }
  0xf8   : > { %2640 = dma.done.wait (%p3033_p4), %s491_s9, 2048  }
  0xf9   : > { %2642 = vsyncadd (%p3033_p4), %s491_s9, 4294965248  ;;  %p3537_p6 = scmp.ne.s32.totalorder %s3509_s20, 0 }
  0xfb   : > { %2644 = dma.done.wait (%p3537_p6), [#allocation8], 4096  }
  0xfc   : > { %2646 = vsyncadd (%p3537_p6), [#allocation8], 4294963200 }
  0xfd   : > { %2648 = dma.done.wait (%p3537_p6), [#allocation11], 4096  }
  0xfe   : > { %2650 = vsyncadd (%p3537_p6), [#allocation11], 4294963200 }
  0xff   : > { %2652 = dma.done.wait (%p3537_p6), [#allocation14], 2048  }
 0x100   : > { %2654 = vsyncadd (%p3537_p6), [#allocation14], 4294965248  ;;  %s3489_s24 = sand.u32 1, %s2669_s26   ;;  %v2715_v0 = vmov 0.0|0.0   ;;  %vm2716_vm0 = vmmov 0   ;;  %v2717_v1 = vmov 0.0  }
 0x101   : > { %s3150_s12 = sshll.u32 %s3489_s24, 4  ;;  %2023 = vmatprep.subr.bf16.mxu0 %v2715_v0  ;;  %1845 = vmatprep.mubr.msk.f32.mxu0 %vm2716_vm0, %v2717_v1  ;;  %v643_v2 = vld [vmem:[#allocation7] sm:$0xff]  ;;  %v644_v3 = vld [vmem:[#allocation7 + $0x8] sm:$0xff]  ;;  %v645_v4 = vld [vmem:[#allocation7 + $0x10] sm:$0xff]  ;;  %vm667_vm1 = vcmask 1041409   ;;  %vm669_vm2 = vcmask 1042434  }
 0x102   : > { %2047 = vmatprep.subr.bf16.mxu1 %v2715_v0  ;;  %1880 = vmatprep.mubr.msk.f32.mxu1 %vm2716_vm0, %v2717_v1  ;;  %v2024_v5 = vpack.c.bf16 %v644_v3, %v643_v2  ;;  %v646_v6 = vld [vmem:[#allocation7 + $0x18] sm:$0xff]  ;;  %v647_v7 = vld [vmem:[#allocation7 + $0x20] sm:$0xff]  ;;  %v648_v8 = vld [vmem:[#allocation7 + $0x28] sm:$0xff]  ;;  %vm671_vm3 = vcmask 1043459   ;;  %vm673_vm4 = vcmask 1044484   ;;  %vm675_vm5 = vcmask 1045509  }
 0x103   : > { %v3154_v9 = vld [vmem:[#allocation7 + $0x30] sm:$0xff]  ;;  %v2027_v10 = vpack.c.bf16 %v646_v6, %v645_v4  ;;  %v3156_v11 = vld [vmem:[#allocation7 + $0x38] sm:$0xff]  ;;  %v3158_v12 = vld [vmem:[#allocation7 + $0x40] sm:$0xff]  ;;  %v2030_v24 = vpack.c.bf16 %v648_v8, %v647_v7  ;;  %vm677_vm6 = vcmask 1046534   ;;  %vm679_vm7 = vcmask 1047559   ;;  %s3538_s22 = sld [smem:[#allocation32_spill]] }
 0x104   : > { %2025 = vmatpush3.bf16.msra.mxu0 %v2024_v5  ;;  %v3160_v13 = vld [vmem:[#allocation7 + $0x48] sm:$0xff]  ;;  %v3163_v14 = vld [vmem:[#allocation7 + $0x50] sm:$0xff]  ;;  %v3165_v15 = vld [vmem:[#allocation7 + $0x58] sm:$0xff]  ;;  %v2033_v25 = vpack.c.bf16 %v3156_v11, %v3154_v9  ;;  %s3539_s6 = sld [smem:[#allocation33_spill]]  ;;  %s3540_s21 = sld [smem:[#allocation35_spill]] }
 0x105   : > { %2026 = vmatprep.subr.bf16.mxu0 %v2715_v0  ;;  %v3167_v16 = vld [vmem:[#allocation7 + $0x60] sm:$0xff]  ;;  %v3169_v17 = vld [vmem:[#allocation7 + $0x68] sm:$0xff]  ;;  %v3178_v20 = vld [vmem:[%s3129_s15 + $0x10] sm:$0xff]  ;;  %v2036_v30 = vpack.c.bf16 %v3160_v13, %v3158_v12  ;;  %v2039_v37 = vpack.c.bf16 %v3165_v15, %v3163_v14  ;;  %s1689_s3 = sshll.u32 %s3125_s8, 3  ;;  %s3541_s20 = sld [smem:[#allocation24_spill]] }
 0x106   : > { %v3172_v18 = vld [vmem:[%s3129_s15] sm:$0xff]  ;;  %v3175_v19 = vld [vmem:[%s3129_s15 + $0x8] sm:$0xff]  ;;  %v3181_v21 = vld [vmem:[%s3129_s15 + $0x18] sm:$0xff]  ;;  %v2042_v38 = vpack.c.bf16 %v3169_v17, %v3167_v16  ;;  %s3276_s9 = scalar_lea.vmem [#allocation15], %s1689_s3 }
 0x107   : > { %v3184_v22 = vld [vmem:[%s3129_s15 + $0x20] sm:$0xff]  ;;  %v579_v23 = vadd.f32 %v3175_v19, %v3172_v18  ;;  %v3191_v26 = vld [vmem:[%s3129_s15 + $0x28] sm:$0xff]  ;;  %v3194_v27 = vld [vmem:[%s3129_s15 + $0x30] sm:$0xff]  ;;  %v586_v29 = vadd.f32 %v3181_v21, %v3178_v20 }
 0x108   : > { %2028 = vmatpush3.bf16.msra.mxu0 %v2027_v10  ;;  %v3197_v28 = vld [vmem:[%s3129_s15 + $0x38] sm:$0xff]  ;;  %v3205_v31 = vld [vmem:[%s3129_s15 + $0x40] sm:$0xff]  ;;  %v3208_v32 = vld [vmem:[%s3129_s15 + $0x48] sm:$0xff]  ;;  %v593_v35 = vadd.f32 %v3191_v26, %v3184_v22 }
 0x109   : > { %2029 = vmatprep.subr.bf16.mxu0 %v2715_v0  ;;  %v3211_v33 = vld [vmem:[%s3129_s15 + $0x50] sm:$0xff]  ;;  %v580_v34 = vrot.slane %v579_v23, 4  ;;  %v600_v36 = vadd.f32 %v3197_v28, %v3194_v27  ;;  %v3222_v39 = vld [vmem:[%s3129_s15 + $0x58] sm:$0xff]  ;;  %v3225_v40 = vld [vmem:[%s3129_s15 + $0x60] sm:$0xff]  ;;  %v587_v42 = vrot.slane %v586_v29, 4  ;;  %v607_v43 = vadd.f32 %v3208_v32, %v3205_v31 }
 0x10a   : > { %v3228_v41 = vld [vmem:[%s3129_s15 + $0x68] sm:$0xff]  ;;  %v3233_v44 = vld [vmem:[%s3129_s15 + $0x70] sm:$0xff]  ;;  %v3236_v45 = vld [vmem:[%s3129_s15 + $0x78] sm:$0xff]  ;;  %v594_v47 = vrot.slane %v593_v35, 4  ;;  %v614_v49 = vadd.f32 %v3222_v39, %v3211_v33  ;;  %s3280_s15 = scalar_lea.vmem [#allocation16], %s3150_s12 }
 0x10b   : > { %v581_v46 = vadd.f32 %v580_v34, %v579_v23  ;;  %v601_v48 = vrot.slane %v600_v36, 4  ;;  %v588_v50 = vadd.f32 %v587_v42, %v586_v29  ;;  %v608_v51 = vrot.slane %v607_v43, 4  ;;  %v777_v14 = vld [vmem:[#allocation9 + $0x20] sm:$0xff]  ;;  %v778_v15 = vld [vmem:[#allocation9 + $0x28] sm:$0xff]  ;;  %p1694_p4 = scmp.ne.s32.totalorder %s3541_s20, 0 }
 0x10c   : > { %2031 = vmatpush3.bf16.msra.mxu0 %v2030_v24  ;;  %v621_v52 = vadd.f32 %v3228_v41, %v3225_v40  ;;  %v628_v53 = vadd.f32 %v3236_v45, %v3233_v44  ;;  %v595_v55 = vadd.f32 %v594_v47, %v593_v35  ;;  %v615_v57 = vrot.slane %v614_v49, 4  ;;  %v774_v47 = vld [vmem:[#allocation9 + $0x8] sm:$0xff]  ;;  %v781_v16 = vld [vmem:[#allocation9 + $0x40] sm:$0xff] }
 0x10d   : > { %2032 = vmatprep.subr.bf16.mxu0 %v2715_v0  ;;  %v582_v54 = vrot.slane %v581_v46, 2  ;;  %v602_v56 = vadd.f32 %v601_v48, %v600_v36  ;;  %v589_v58 = vrot.slane %v588_v50, 2  ;;  %v609_v59 = vadd.f32 %v608_v51, %v607_v43  ;;  %v782_v17 = vld [vmem:[#allocation9 + $0x48] sm:$0xff] }
 0x10e   : > { %v622_v60 = vrot.slane %v621_v52, 4  ;;  %v629_v61 = vrot.slane %v628_v53, 4  ;;  %v596_v63 = vrot.slane %v595_v55, 2  ;;  %v616_v2 = vadd.f32 %v615_v57, %v614_v49  ;;  %v776_v57 = vld [vmem:[#allocation9 + $0x18] sm:$0xff] }
 0x10f   : > { %v583_v62 = vadd.f32 %v582_v54, %v581_v46  ;;  %v603_v1 = vrot.slane %v602_v56, 2  ;;  %v590_v3 = vadd.f32 %v589_v58, %v588_v50  ;;  %v610_v4 = vrot.slane %v609_v59, 2  ;;  %v773_v46 = vld [vmem:[#allocation9] sm:$0xff] }
 0x110   : > { %2034 = vmatpush3.bf16.msra.mxu0 %v2033_v25  ;;  %v623_v5 = vadd.f32 %v622_v60, %v621_v52  ;;  %v630_v6 = vadd.f32 %v629_v61, %v628_v53  ;;  %v597_v8 = vadd.f32 %v596_v63, %v595_v55  ;;  %v617_v10 = vrot.slane %v616_v2, 2 }
 0x111   : > { %2035 = vmatprep.subr.bf16.mxu0 %v2715_v0  ;;  %v584_v7 = vrot.slane %v583_v62, 1  ;;  %v604_v9 = vadd.f32 %v603_v1, %v602_v56  ;;  %v591_v11 = vrot.slane %v590_v3, 1  ;;  %v611_v12 = vadd.f32 %v610_v4, %v609_v59  ;;  %v775_v56 = vld [vmem:[#allocation9 + $0x10] sm:$0xff] }
 0x112   : > { %v624_v13 = vrot.slane %v623_v5, 2  ;;  %v631_v23 = vrot.slane %v630_v6, 2  ;;  %v598_v29 = vrot.slane %v597_v8, 1  ;;  %v618_v35 = vadd.f32 %v617_v10, %v616_v2  ;;  %v657_v2 = vld [vmem:[#allocation7 + $0x70] sm:$0xff] }
 0x113   : > { %v585_v24 = vadd.f32 %v584_v7, %v583_v62  ;;  %v605_v34 = vrot.slane %v604_v9, 1  ;;  %v592_v25 = vadd.f32 %v591_v11, %v590_v3  ;;  %v612_v36 = vrot.slane %v611_v12, 1  ;;  %v658_v3 = vld [vmem:[#allocation7 + $0x78] sm:$0xff] }
 0x114   : > { %2037 = vmatpush3.bf16.msra.mxu0 %v2036_v30  ;;  %v625_v42 = vadd.f32 %v624_v13, %v623_v5  ;;  %v632_v43 = vadd.f32 %v631_v23, %v630_v6  ;;  %v599_v48 = vadd.f32 %v598_v29, %v597_v8  ;;  %v619_v50 = vrot.slane %v618_v35, 1  ;;  %v779_v23 = vld [vmem:[#allocation9 + $0x30] sm:$0xff] }
 0x115   : > { %2038 = vmatprep.subr.bf16.mxu0 %v2715_v0  ;;  %v606_v49 = vadd.f32 %v605_v34, %v604_v9  ;;  %v635_v51 = vmul.f32 0.0625, %v585_v24  ;;  %v613_v52 = vadd.f32 %v612_v36, %v611_v12  ;;  %v636_v55 = vmul.f32 0.0625, %v592_v25  ;;  %v780_v24 = vld [vmem:[#allocation9 + $0x38] sm:$0xff] }
 0x116   : > { %v626_v53 = vrot.slane %v625_v42, 1  ;;  %v633_v54 = vrot.slane %v632_v43, 1  ;;  %v620_v58 = vadd.f32 %v619_v50, %v618_v35  ;;  %v637_v30 = vmul.f32 0.0625, %v599_v48  ;;  %v783_v35 = vld [vmem:[#allocation9 + $0x50] sm:$0xff]  ;;  %v784_v25 = vld [vmem:[#allocation9 + $0x58] sm:$0xff] }
 0x117   : > { %v638_v59 = vmul.f32 0.0625, %v606_v49  ;;  %v2048_v60 = vpack.c.bf16 %v774_v47, %v773_v46  ;;  %v639_v63 = vmul.f32 0.0625, %v613_v52  ;;  %v668_v1 = vsel %vm667_vm1, %v636_v55, %v635_v51  ;;  %v787_v47 = vld [vmem:[#allocation9 + $0x70] sm:$0xff]  ;;  %v788_v48 = vld [vmem:[#allocation9 + $0x78] sm:$0xff]  ;;  %v1691_v50 = vld [vmem:[%s3538_s22] ss:$0 sm:$0xff] }
 0x118   : > { %2040 = vmatpush3.bf16.msra.mxu0 %v2039_v37  ;;  %v627_v61 = vadd.f32 %v626_v53, %v625_v42  ;;  %v634_v62 = vadd.f32 %v633_v54, %v632_v43  ;;  %v640_v4 = vmul.f32 0.0625, %v620_v58  ;;  %v670_v5 = vsel %vm669_vm2, %v637_v30, %v668_v1  ;;  %v785_v42 = vld [vmem:[#allocation9 + $0x60] sm:$0xff]  ;;  %v786_v43 = vld [vmem:[#allocation9 + $0x68] sm:$0xff] }
 0x119   : > { %2041 = vmatprep.subr.bf16.mxu0 %v2715_v0  ;;  %2049 = vmatpush3.bf16.msra.mxu1 %v2048_v60  ;;  %v2051_v6 = vpack.c.bf16 %v776_v57, %v775_v56  ;;  %v672_v8 = vsel %vm671_vm3, %v638_v59, %v670_v5  ;;  %v2045_v9 = vpack.c.bf16 %v658_v3, %v657_v2  ;;  %v1692_v52 = vld [vmem:[%s3539_s6] ss:$0 sm:$0xff]  ;;  %v2718_v5 = vmov (!%p1694_p4), 0.0  }
 0x11a   : > { %v641_v7 = vmul.f32 0.0625, %v627_v61  ;;  %2050 = vmatprep.subr.bf16.mxu1 %v2715_v0  ;;  %v674_v37 = vsel %vm673_vm4, %v639_v63, %v672_v8  ;;  %v642_v10 = vmul.f32 0.0625, %v634_v62  ;;  %v2054_v13 = vpack.c.bf16 %v778_v15, %v777_v14  ;;  %v1693_v59 = vld [vmem:[%s3540_s21] ss:$0 sm:$0xff]  ;;  %877 = vst [vmem:[#allocation2] sm:$0xff] (!%p1694_p4), %v2718_v5  ;;  %878 = vst [vmem:[#allocation2 + $0x8] sm:$0xff] (!%p1694_p4), %v2718_v5 }
 0x11b   : > { %v676_v11 = vsel %vm675_vm5, %v640_v4, %v674_v37  ;;  %v2057_v34 = vpack.c.bf16 %v780_v24, %v779_v23  ;;  %v2063_v36 = vpack.c.bf16 %v784_v25, %v783_v35  ;;  %v2066_v46 = vpack.c.bf16 %v786_v43, %v785_v42  ;;  %879 = vst [vmem:[#allocation3] sm:$0xff] (!%p1694_p4), %v2718_v5 }
 0x11c   : > { %2043 = vmatpush3.bf16.msra.mxu0 %v2042_v38  ;;  %v678_v12 = vsel %vm677_vm6, %v641_v7, %v676_v11  ;;  %v2060_v38 = vpack.c.bf16 %v782_v17, %v781_v16  ;;  %v2069_v49 = vpack.c.bf16 %v788_v48, %v787_v47  ;;  %880 = vst [vmem:[#allocation3 + $0x8] sm:$0xff] (!%p1694_p4), %v2718_v5 }
 0x11d   : > { %2044 = vmatprep.subr.bf16.mxu0 %v2715_v0  ;;  %2052 = vmatpush3.bf16.msra.mxu1 %v2051_v6  ;;  %v680_v29 = vsel %vm679_vm7, %v642_v10, %v678_v12 }
 0x11e   : > { %2053 = vmatprep.subr.bf16.mxu1 %v2715_v0 }
 0x120   : > { %2046 = vmatpush3.bf16.msra.mxu0 %v2045_v9 }
 0x121   : > { %2055 = vmatpush3.bf16.msra.mxu1 %v2054_v13 }
 0x122   : > { %2056 = vmatprep.subr.bf16.mxu1 %v2715_v0 }
 0x123   : > { %1846 = vmatmul.mubr.f32.vlgmr.msra.gmra.mrb[0].mxu0 %v680_v29 }
 0x125   : > { %2058 = vmatpush3.bf16.msra.mxu1 %v2057_v34 }
 0x126   : > { %2059 = vmatprep.subr.bf16.mxu1 %v2715_v0 }
 0x129   : > { %2061 = vmatpush3.bf16.msra.mxu1 %v2060_v38 }
 0x12a   : > { %2062 = vmatprep.subr.bf16.mxu1 %v2715_v0 }
 0x12d   : > { %2064 = vmatpush3.bf16.msra.mxu1 %v2063_v36 }
 0x12e   : > { %2065 = vmatprep.subr.bf16.mxu1 %v2715_v0 }
 0x131   : > { %2067 = vmatpush3.bf16.msra.mxu1 %v2066_v46 }
 0x132   : > { %2068 = vmatprep.subr.bf16.mxu1 %v2715_v0 }
 0x135   : > { %2070 = vmatpush3.bf16.msra.mxu1 %v2069_v49 }
 0x1f6   : > { %v748_v51 = vpop.f32.mrb[0].mxu0 }
 0x1f7   : > { %v759_v53 = vmul.f32 %v1691_v50, %v748_v51  ;;  %v1847_v54 = vpop.f32.mrb[1].mxu0 }
 0x1f9   : > { %v767_v55 = vadd.f32 %v1692_v52, %v759_v53 }
 0x1fb   : > { %v768_v56 = vadd.f32 3.0, %v767_v55 }
 0x1fd   : > { %v769_v57 = vmax.f32 %v768_v56, 0.0 }
 0x1ff   : > { %v770_v0 = vmin.f32 %v769_v57, 6.0 }
 0x201   : > { %v771_v58 = vmul.f32 %v770_v0, %v767_v55 }
 0x203   : > { %v772_v30 = vmul.f32 0.16666667, %v771_v58 }
 0x205   : > { %1881 = vmatmul.mubr.f32.vlgmr.msra.gmra.mrb[0].mxu1 %v772_v30 }
 0x2d8   : > { %v862_v60 = vpop.f32.mrb[0].mxu1 }
 0x2d9   : > { %v863_v61 = vadd.f32 %v1693_v59, %v862_v60  ;;  %v1882_v62 = vpop.f32.mrb[1].mxu1 }
 0x2db   : > { %v866_v63 = vsub.f32 0.0, %v863_v61 }
 0x2dd   : > { %v867_v1 = vmul.f32 1.442695, %v866_v63 }
 0x2df   : > { %2353 = vpow2.f32 %v867_v1 }
 0x2e9   : > { %v2354_v2 = vpop.eup %2353 }
 0x2ea   : > { %v869_v3 = vadd.f32 1.0, %v2354_v2 }
 0x2ec   : > { %2355 = vrcp.f32 %v869_v3 }
 0x2f1   : > { %876 = sbr.rel (%p1694_p4) target bundleno = 760 (0x2f8), region = 96 }
 0x2f6   : > { %v2356_v4 = vpop.eup %2355 }
 0x2f7   : > { %872 = vst [vmem:[%s3276_s9] sm:$0xff] %v2356_v4 }
 0x2f8 PF: > { %v883_v6 = vadd.f32 %v3178_v20, %v3172_v18  ;;  %v890_v7 = vadd.f32 %v3181_v21, %v3175_v19  ;;  %v2719_v8 = vmov 1966171168   ;;  %v910_v15 = vlaneseq  ;;  %v881_v54 = vld [vmem:[#allocation2] sm:$0xff]  ;;  %v882_v55 = vld [vmem:[#allocation2 + $0x8] sm:$0xff]  ;;  %s3542_s12 = sld [smem:[#allocation24_spill]] }
 0x2f9   : > { %v908_v14 = vunpack.c.l.s4 %v2719_v8  ;;  %v906_v10 = vcombine.high %v2356_v4, %v2356_v4 }
 0x2fa   : > { %v884_v37 = vadd.f32 %v883_v6, %v3184_v22  ;;  %v891_v9 = vadd.f32 %v890_v7, %v3191_v26  ;;  %v911_v12 = vshrl.u32 %v910_v15, 7 }
 0x2fb   : > { %v909_v11 = vunpack.c.0.s8 %v908_v14 }
 0x2fc   : > { %v885_v13 = vadd.f32 %v884_v37, %v3194_v27  ;;  %v892_v23 = vadd.f32 %v891_v9, %v3197_v28  ;;  %v3295_v25 = vsub.s32 0, %v911_v12 }
 0x2fd   : > { %v912_v24 = vsub.s32 %v909_v11, %v911_v12 }
 0x2fe   : > { %v886_v29 = vadd.f32 %v885_v13, %v3205_v31  ;;  %v893_v34 = vadd.f32 %v892_v23, %v3208_v32  ;;  %p1695_p5 = scmp.ne.s32.totalorder %s3542_s12, 1 }
 0x2ff   : > { %v913_v16 = vrot.slane %v2356_v4, %v912_v24  ;;  %v920_v17 = vrot.slane %v906_v10, %v912_v24  ;;  %s3543_s4 = sld [smem:[#allocation32_spill]] (!%p1695_p5)  ;;  %s3544_s23 = sld [smem:[#allocation33_spill]] (!%p1695_p5)  ;;  %vm2721_vm8 = vmmov (!%p1695_p5), 0  }
 0x300   : > { %v887_v38 = vadd.f32 %v886_v29, %v3211_v33  ;;  %v894_v35 = vadd.f32 %v893_v34, %v3222_v39  ;;  %s3545_s3 = sld [smem:[#allocation37_spill]] (!%p1695_p5)  ;;  %s3546_s0 = sld [smem:[#allocation39_spill]] (!%p1695_p5) }
 0x301   : > { %v921_v36 = vcombine.high %v913_v16, %v913_v16  ;;  %v922_v42 = vcombine.high %v920_v17, %v920_v17  ;;  %v929_v43 = vrot.slane %v913_v16, %v912_v24  ;;  %v936_v52 = vrot.slane %v920_v17, %v912_v24  ;;  %s3547_s19 = sld [smem:[#allocation41_spill]] (!%p1695_p5) }
 0x302   : > { %v888_v46 = vadd.f32 %v887_v38, %v3225_v40  ;;  %v895_v47 = vadd.f32 %v894_v35, %v3228_v41  ;;  %v903_v38 = vld [vmem:[#allocation3] sm:$0xff] }
 0x303   : > { %v943_v48 = vrot.slane %v921_v36, %v912_v24  ;;  %v951_v49 = vcombine.high %v929_v43, %v929_v43  ;;  %v958_v53 = vrot.slane %v929_v43, %v3295_v25  ;;  %v950_v56 = vrot.slane %v922_v42, %v912_v24  ;;  %v904_v36 = vld [vmem:[#allocation3 + $0x8] sm:$0xff] }
 0x304   : > { %v889_v50 = vadd.f32 %v888_v46, %v3233_v44  ;;  %v896_v51 = vadd.f32 %v895_v47, %v3236_v45  ;;  %v952_v60 = vcombine.high %v936_v52, %v936_v52  ;;  %v974_v3 = vrot.slane %v936_v52, %v3295_v25  ;;  %v1038_v47 = vld [vmem:[#allocation7 + $0x18] sm:$0xff] (!%p1695_p5) }
 0x305   : > { %v953_v57 = vcombine.high %v943_v48, %v943_v48  ;;  %v962_v0 = vrot.slane %v943_v48, %v3295_v25  ;;  %v966_v58 = vrot.slane %v951_v49, %v3295_v25  ;;  %v995_v62 = vmul.f32 %v958_v53, %v3172_v18  ;;  %v1040_v49 = vld [vmem:[#allocation7 + $0x28] sm:$0xff] (!%p1695_p5)  ;;  %v1042_v52 = vld [vmem:[#allocation7 + $0x38] sm:$0xff] (!%p1695_p5) }
 0x306   : > { %v897_v30 = vmul.f32 0.0625, %v889_v50  ;;  %v898_v59 = vmul.f32 0.0625, %v896_v51  ;;  %v954_v5 = vcombine.high %v950_v56, %v950_v56  ;;  %v978_v6 = vrot.slane %v950_v56, %v3295_v25  ;;  %v1041_v51 = vld [vmem:[#allocation7 + $0x30] sm:$0xff] (!%p1695_p5) }
 0x307   : > { %v970_v61 = vrot.slane %v953_v57, %v3295_v25  ;;  %v997_v63 = vmul.f32 %v962_v0, %v3178_v20  ;;  %v999_v4 = vmul.f32 %v966_v58, %v3184_v22  ;;  %v996_v14 = vmul.f32 %v958_v53, %v3175_v19  ;;  %v1156_v56 = vld [vmem:[#allocation10 + $0x10] sm:$0xff] (!%p1695_p5) }
 0x308   : > { %v899_v1 = vadd.f32 %v897_v30, %v881_v54  ;;  %v900_v2 = vadd.f32 %v898_v59, %v882_v55  ;;  %v998_v18 = vmul.f32 %v962_v0, %v3181_v21  ;;  %v1000_v20 = vmul.f32 %v966_v58, %v3191_v26  ;;  %v1154_v54 = vld [vmem:[#allocation10] sm:$0xff] (!%p1695_p5)  ;;  %v1155_v55 = vld [vmem:[#allocation10 + $0x8] sm:$0xff] (!%p1695_p5)  ;;  %v1157_v0 = vld [vmem:[#allocation10 + $0x18] sm:$0xff] (!%p1695_p5) }
 0x309   : > { %v1001_v7 = vmul.f32 %v970_v61, %v3194_v27  ;;  %v1011_v8 = vadd.f32 %v997_v63, %v995_v62  ;;  %v982_v15 = vrot.slane %v952_v60, %v3295_v25  ;;  %v1003_v37 = vmul.f32 %v974_v3, %v3205_v31  ;;  %v1158_v30 = vld [vmem:[#allocation10 + $0x20] sm:$0xff] (!%p1695_p5)  ;;  %v1159_v59 = vld [vmem:[#allocation10 + $0x28] sm:$0xff] (!%p1695_p5) }
 0x30a   : > { %901 = vst [vmem:[#allocation2] sm:$0xff] %v899_v1  ;;  %902 = vst [vmem:[#allocation2 + $0x8] sm:$0xff] %v900_v2  ;;  %v1002_v22 = vmul.f32 %v970_v61, %v3197_v28  ;;  %v1018_v10 = vadd.f32 %v998_v18, %v996_v14  ;;  %v986_v11 = vrot.slane %v954_v5, %v3295_v25  ;;  %v1043_v61 = vld [vmem:[#allocation7 + $0x40] sm:$0xff] (!%p1695_p5)  ;;  %v1044_v62 = vld [vmem:[#allocation7 + $0x48] sm:$0xff] (!%p1695_p5) }
 0x30b   : > { %v1012_v9 = vadd.f32 %v1011_v8, %v999_v4  ;;  %v1005_v27 = vmul.f32 %v978_v6, %v3211_v33  ;;  %v1004_v13 = vmul.f32 %v974_v3, %v3208_v32  ;;  %v1007_v21 = vmul.f32 %v982_v15, %v3225_v40  ;;  %v1160_v1 = vld [vmem:[#allocation10 + $0x30] sm:$0xff] (!%p1695_p5)  ;;  %v1161_v2 = vld [vmem:[#allocation10 + $0x38] sm:$0xff] (!%p1695_p5)  ;;  %v1047_v8 = vld [vmem:[#allocation7 + $0x60] sm:$0xff] (!%p1695_p5) }
 0x30c   : > { %v1019_v19 = vadd.f32 %v1018_v10, %v1000_v20  ;;  %v1006_v26 = vmul.f32 %v978_v6, %v3222_v39  ;;  %v1009_v31 = vmul.f32 %v986_v11, %v3233_v44  ;;  %v1008_v28 = vmul.f32 %v982_v15, %v3228_v41  ;;  %v1035_v39 = vld [vmem:[#allocation7] sm:$0xff] (!%p1695_p5)  ;;  %v1036_v44 = vld [vmem:[#allocation7 + $0x8] sm:$0xff] (!%p1695_p5)  ;;  %v1037_v41 = vld [vmem:[#allocation7 + $0x10] sm:$0xff] (!%p1695_p5) }
 0x30d   : > { %v1013_v12 = vadd.f32 %v1012_v9, %v1001_v7  ;;  %v1010_v17 = vmul.f32 %v986_v11, %v3236_v45  ;;  %v2071_v46 = vpack.c.bf16 (!%p1695_p5), %v1036_v44, %v1035_v39  ;;  %v2075_v48 = vpack.c.bf16 (!%p1695_p5), %v1038_v47, %v1037_v41  ;;  %v1039_v45 = vld [vmem:[#allocation7 + $0x20] sm:$0xff] (!%p1695_p5)  ;;  %v1045_v4 = vld [vmem:[#allocation7 + $0x50] sm:$0xff] (!%p1695_p5)  ;;  %v1046_v5 = vld [vmem:[#allocation7 + $0x58] sm:$0xff] (!%p1695_p5) }
 0x30e   : > { %v1020_v24 = vadd.f32 %v1019_v19, %v1002_v22  ;;  %v2079_v50 = vpack.c.bf16 (!%p1695_p5), %v1040_v49, %v1039_v45  ;;  %v2103_v57 = vpack.c.bf16 (!%p1695_p5), %v1155_v55, %v1154_v54  ;;  %v2107_v58 = vpack.c.bf16 (!%p1695_p5), %v1157_v0, %v1156_v56  ;;  %v1048_v14 = vld [vmem:[#allocation7 + $0x68] sm:$0xff] (!%p1695_p5)  ;;  %v1049_v20 = vld [vmem:[#allocation7 + $0x70] sm:$0xff] (!%p1695_p5)  ;;  %v1050_v15 = vld [vmem:[#allocation7 + $0x78] sm:$0xff] (!%p1695_p5) }
 0x30f   : > { %v1014_v23 = vadd.f32 %v1013_v12, %v1003_v37  ;;  %2072 = vmatprep.subr.bf16.mxu0 (!%p1695_p5), %v2071_v46  ;;  %v2083_v60 = vpack.c.bf16 (!%p1695_p5), %v1042_v52, %v1041_v51  ;;  %v2111_v63 = vpack.c.bf16 (!%p1695_p5), %v1159_v59, %v1158_v30  ;;  %v2087_v3 = vpack.c.bf16 (!%p1695_p5), %v1044_v62, %v1043_v61  ;;  %v1162_v22 = vld [vmem:[#allocation10 + $0x40] sm:$0xff] (!%p1695_p5)  ;;  %v1163_v10 = vld [vmem:[#allocation10 + $0x48] sm:$0xff] (!%p1695_p5)  ;;  %v1165_v12 = vld [vmem:[#allocation10 + $0x58] sm:$0xff] (!%p1695_p5) }
 0x310   : > { %v1021_v34 = vadd.f32 %v1020_v24, %v1004_v13  ;;  %2074 = vmatpush3.bf16.msra.mxu0 (!%p1695_p5), %v2071_v46  ;;  %2104 = vmatprep.subr.bf16.mxu1 (!%p1695_p5), %v2103_v57  ;;  %v2115_v6 = vpack.c.bf16 (!%p1695_p5), %v1161_v2, %v1160_v1  ;;  %v2091_v7 = vpack.c.bf16 (!%p1695_p5), %v1046_v5, %v1045_v4  ;;  %v1166_v19 = vld [vmem:[#allocation10 + $0x60] sm:$0xff] (!%p1695_p5)  ;;  %v1169_v24 = vld [vmem:[#allocation10 + $0x78] sm:$0xff] (!%p1695_p5)  ;;  %v1277_v45 = vld [vmem:[#allocation12 + $0x8] sm:$0xff] (!%p1695_p5)  ;;  %v2722_v56 = vmov (!%p1695_p5), 0.0  }
 0x311   : > { %v1015_v29 = vadd.f32 %v1014_v23, %v1005_v27  ;;  %2076 = vmatprep.subr.bf16.mxu0 (!%p1695_p5), %v2075_v48  ;;  %v1033_v53 = vld [vmem:[#allocation2] sm:$0xff] (!%p1695_p5)  ;;  %2106 = vmatpush3.bf16.msra.mxu1 (!%p1695_p5), %v2103_v57  ;;  %v2095_v18 = vpack.c.bf16 (!%p1695_p5), %v1048_v14, %v1047_v8  ;;  %v2099_v37 = vpack.c.bf16 (!%p1695_p5), %v1050_v15, %v1049_v20  ;;  %v1034_v9 = vld [vmem:[#allocation2 + $0x8] sm:$0xff] (!%p1695_p5)  ;;  %v1164_v27 = vld [vmem:[#allocation10 + $0x50] sm:$0xff] (!%p1695_p5) }
 0x312   : > { %v1022_v33 = vadd.f32 %v1021_v34, %v1006_v26  ;;  %1915 = vmatprep.mubr.f32.mxu0 (!%p1695_p5), %v1033_v53  ;;  %2108 = vmatprep.subr.bf16.mxu1 (!%p1695_p5), %v2107_v58  ;;  %v2119_v11 = vpack.c.bf16 (!%p1695_p5), %v1163_v10, %v1162_v22  ;;  %v2123_v13 = vpack.c.bf16 (!%p1695_p5), %v1165_v12, %v1164_v27  ;;  %v1168_v26 = vld [vmem:[#allocation10 + $0x70] sm:$0xff] (!%p1695_p5)  ;;  %v1697_v34 = vld [vmem:[%s3544_s23] ss:$0 sm:$0xff] (!%p1695_p5)  ;;  %v1279_v52 = vld [vmem:[#allocation12 + $0x18] sm:$0xff] (!%p1695_p5) }
 0x313   : > { %v1016_v16 = vadd.f32 %v1015_v29, %v1007_v21  ;;  %v1167_v21 = vld [vmem:[#allocation10 + $0x68] sm:$0xff] (!%p1695_p5)  ;;  %v1696_v29 = vld [vmem:[%s3543_s4] ss:$0 sm:$0xff] (!%p1695_p5)  ;;  %v1278_v51 = vld [vmem:[#allocation12 + $0x10] sm:$0xff] (!%p1695_p5) }
 0x314   : > { %v1023_v32 = vadd.f32 %v1022_v33, %v1008_v28  ;;  %1032 = sbr.rel (%p1695_p5) target bundleno = 1767 (0x6e7), region = 100  ;;  %2078 = vmatpush3.bf16.msra.mxu0 (!%p1695_p5), %v2075_v48  ;;  %v2127_v23 = vpack.c.bf16 (!%p1695_p5), %v1167_v21, %v1166_v19  ;;  %v1276_v48 = vld [vmem:[#allocation12] sm:$0xff] (!%p1695_p5)  ;;  %v2139_v53 = vpack.c.bf16 (!%p1695_p5), %v1279_v52, %v1278_v51  ;;  %v1281_v55 = vld [vmem:[#allocation12 + $0x28] sm:$0xff] (!%p1695_p5)  ;;  %v1282_v0 = vld [vmem:[#allocation12 + $0x30] sm:$0xff] (!%p1695_p5) }
 0x315   : > { %v1017_v35 = vadd.f32 %v1016_v16, %v1009_v31  ;;  %2080 = vmatprep.subr.bf16.mxu0 (!%p1695_p5), %v2079_v50  ;;  %2110 = vmatpush3.bf16.msra.mxu1 (!%p1695_p5), %v2107_v58  ;;  %v2131_v31 = vpack.c.bf16 (!%p1695_p5), %v1169_v24, %v1168_v26  ;;  %v2136_v49 = vpack.c.bf16 (!%p1695_p5), %v1277_v45, %v1276_v48  ;;  %v1280_v54 = vld [vmem:[#allocation12 + $0x20] sm:$0xff] (!%p1695_p5)  ;;  %v1283_v58 = vld [vmem:[#allocation12 + $0x38] sm:$0xff] (!%p1695_p5)  ;;  %v1286_v62 = vld [vmem:[#allocation12 + $0x50] sm:$0xff] (!%p1695_p5) }
 0x316   : > { %v1024_v40 = vadd.f32 %v1023_v32, %v1010_v17  ;;  %2112 = vmatprep.subr.bf16.mxu1 (!%p1695_p5), %v2111_v63  ;;  %v2142_v57 = vpack.c.bf16 (!%p1695_p5), %v1281_v55, %v1280_v54  ;;  %v2145_v30 = vpack.c.bf16 (!%p1695_p5), %v1283_v58, %v1282_v0  ;;  %v1284_v59 = vld [vmem:[#allocation12 + $0x40] sm:$0xff] (!%p1695_p5)  ;;  %v1290_v5 = vld [vmem:[#allocation12 + $0x70] sm:$0xff] (!%p1695_p5)  ;;  %v1365_v14 = vld [vmem:[#allocation13 + $0x8] sm:$0xff] (!%p1695_p5) }
 0x317   : > { %v1025_v42 = vadd.f32 %v1017_v35, %v903_v38  ;;  %v1288_v2 = vld [vmem:[#allocation12 + $0x60] sm:$0xff] (!%p1695_p5)  ;;  %v1367_v15 = vld [vmem:[#allocation13 + $0x18] sm:$0xff] (!%p1695_p5)  ;;  %v1369_v22 = vld [vmem:[#allocation13 + $0x28] sm:$0xff] (!%p1695_p5) }
 0x318   : > { %v1026_v43 = vadd.f32 %v1024_v40, %v904_v36  ;;  %2082 = vmatpush3.bf16.msra.mxu0 (!%p1695_p5), %v2079_v50  ;;  %v2720_v50 = vmov (!%p1695_p5), 0.0|0.0   ;;  %v1364_v8 = vld [vmem:[#allocation13] sm:$0xff] (!%p1695_p5)  ;;  %v1371_v27 = vld [vmem:[#allocation13 + $0x38] sm:$0xff] (!%p1695_p5)  ;;  %v1373_v19 = vld [vmem:[#allocation13 + $0x48] sm:$0xff] (!%p1695_p5) }
 0x319   : > { %1027 = vst [vmem:[#allocation3] sm:$0xff] %v1025_v42  ;;  %2084 = vmatprep.subr.bf16.mxu0 (!%p1695_p5), %v2083_v60  ;;  %2114 = vmatpush3.bf16.msra.mxu1 (!%p1695_p5), %v2111_v63  ;;  %v1287_v63 = vld [vmem:[#allocation12 + $0x58] sm:$0xff] (!%p1695_p5)  ;;  %v2160_v20 = vpack.c.bf16 (!%p1695_p5), %v1365_v14, %v1364_v8  ;;  %v1378_v0 = vld [vmem:[#allocation13 + $0x70] sm:$0xff] (!%p1695_p5) }
 0x31a   : > { %1028 = vst [vmem:[#allocation3 + $0x8] sm:$0xff] %v1026_v43  ;;  %2116 = vmatprep.subr.bf16.mxu1 (!%p1695_p5), %v2115_v6  ;;  %v2151_v1 = vpack.c.bf16 (!%p1695_p5), %v1287_v63, %v1286_v62  ;;  %v1375_v26 = vld [vmem:[#allocation13 + $0x58] sm:$0xff] (!%p1695_p5) }
 0x31b   : > { %v1379_v58 = vld [vmem:[#allocation13 + $0x78] sm:$0xff] }
 0x31c   : > { %2086 = vmatpush3.bf16.msra.mxu0 %v2083_v60  ;;  %v1285_v60 = vld [vmem:[#allocation12 + $0x48] sm:$0xff] }
 0x31d   : > { %2088 = vmatprep.subr.bf16.mxu0 %v2087_v3  ;;  %2118 = vmatpush3.bf16.msra.mxu1 %v2115_v6  ;;  %v2148_v61 = vpack.c.bf16 %v1285_v60, %v1284_v59  ;;  %v1291_v6 = vld [vmem:[#allocation12 + $0x78] sm:$0xff]  ;;  %v1292_v59 = vld [vmem:[%s3546_s0] sm:$0x1] }
 0x31e   : > { %2120 = vmatprep.subr.bf16.mxu1 %v2119_v11 }
 0x320   : > { %2090 = vmatpush3.bf16.msra.mxu0 %v2087_v3  ;;  %v1289_v3 = vld [vmem:[#allocation12 + $0x68] sm:$0xff] }
 0x321   : > { %2092 = vmatprep.subr.bf16.mxu0 %v2091_v7  ;;  %2122 = vmatpush3.bf16.msra.mxu1 %v2119_v11  ;;  %v2154_v4 = vpack.c.bf16 %v1289_v3, %v1288_v2  ;;  %v1370_v11 = vld [vmem:[#allocation13 + $0x30] sm:$0xff] }
 0x322   : > { %2124 = vmatprep.subr.bf16.mxu1 %v2123_v13  ;;  %v2169_v12 = vpack.c.bf16 %v1371_v27, %v1370_v11 }
 0x324   : > { %2094 = vmatpush3.bf16.msra.mxu0 %v2091_v7  ;;  %v2157_v7 = vpack.c.bf16 %v1291_v6, %v1290_v5 }
 0x325   : > { %2096 = vmatprep.subr.bf16.mxu0 %v2095_v18  ;;  %2126 = vmatpush3.bf16.msra.mxu1 %v2123_v13  ;;  %v1372_v13 = vld [vmem:[#allocation13 + $0x40] sm:$0xff] }
 0x326   : > { %2128 = vmatprep.subr.bf16.mxu1 %v2127_v23  ;;  %v2172_v21 = vpack.c.bf16 %v1373_v19, %v1372_v13 }
 0x328   : > { %2098 = vmatpush3.bf16.msra.mxu0 %v2095_v18  ;;  %v1366_v18 = vld [vmem:[#allocation13 + $0x10] sm:$0xff] }
 0x329   : > { %2100 = vmatprep.subr.bf16.mxu0 %v2099_v37  ;;  %2130 = vmatpush3.bf16.msra.mxu1 %v2127_v23  ;;  %v1374_v23 = vld [vmem:[#allocation13 + $0x50] sm:$0xff] }
 0x32a   : > { %2132 = vmatprep.subr.bf16.mxu1 %v2131_v31  ;;  %v2175_v24 = vpack.c.bf16 %v1375_v26, %v1374_v23 }
 0x32c   : > { %2102 = vmatpush3.bf16.msra.mxu0 %v2099_v37  ;;  %v2163_v37 = vpack.c.bf16 %v1367_v15, %v1366_v18 }
 0x32d   : > { %2134 = vmatpush3.bf16.msra.mxu1 %v2131_v31  ;;  %2135 = vmatprep.subr.bf16.mxu0 %v2720_v50  ;;  %v1376_v31 = vld [vmem:[#allocation13 + $0x60] sm:$0xff] }
 0x32e   : > { %2159 = vmatprep.subr.bf16.mxu1 %v2720_v50 }
 0x32f   : > { %1916 = vmatmul.mubr.f32.vlgmr.msra.gmra.mrb[0].mxu0 %v1034_v9  ;;  %v1368_v9 = vld [vmem:[#allocation13 + $0x20] sm:$0xff] }
 0x330   : > { %2137 = vmatpush3.bf16.msra.mxu0 %v2136_v49  ;;  %1985 = vmatprep.mubr.msk.f32.mxu0 %vm2721_vm8, %v2722_v56  ;;  %v2166_v10 = vpack.c.bf16 %v1369_v22, %v1368_v9 }
 0x331   : > { %2138 = vmatprep.subr.bf16.mxu0 %v2720_v50 }
 0x334   : > { %2140 = vmatpush3.bf16.msra.mxu0 %v2139_v53 }
 0x335   : > { %2141 = vmatprep.subr.bf16.mxu0 %v2720_v50 }
 0x338   : > { %2143 = vmatpush3.bf16.msra.mxu0 %v2142_v57 }
 0x339   : > { %2144 = vmatprep.subr.bf16.mxu0 %v2720_v50 }
 0x33c   : > { %2146 = vmatpush3.bf16.msra.mxu0 %v2145_v30  ;;  %v2181_v30 = vpack.c.bf16 %v1379_v58, %v1378_v0 }
 0x33d   : > { %2147 = vmatprep.subr.bf16.mxu0 %v2720_v50 }
 0x340   : > { %2149 = vmatpush3.bf16.msra.mxu0 %v2148_v61 }
 0x341   : > { %2150 = vmatprep.subr.bf16.mxu0 %v2720_v50 }
 0x344   : > { %2152 = vmatpush3.bf16.msra.mxu0 %v2151_v1  ;;  %v1380_v1 = vld [vmem:[%s3547_s19] sm:$0x1] }
 0x345   : > { %2153 = vmatprep.subr.bf16.mxu0 %v2720_v50 }
 0x348   : > { %2155 = vmatpush3.bf16.msra.mxu0 %v2154_v4 }
 0x349   : > { %2156 = vmatprep.subr.bf16.mxu0 %v2720_v50 }
 0x34c   : > { %2158 = vmatpush3.bf16.msra.mxu0 %v2157_v7 }
 0x402   : > { %v1917_v28 = vpop.f32.mrb[0].mxu0 }
 0x403   : > { %v1134_v16 = vmul.f32 %v1917_v28, %v1696_v29  ;;  %v1117_v17 = vpop.f32.mrb[1].mxu0 }
 0x404   : > { %v1133_v33 = vmul.f32 %v1696_v29, %v1117_v17  ;;  %v1377_v29 = vld [vmem:[#allocation13 + $0x68] sm:$0xff] }
 0x405   : > { %v1143_v38 = vadd.f32 %v1697_v34, %v1134_v16  ;;  %v2178_v28 = vpack.c.bf16 %v1377_v29, %v1376_v31 }
 0x406   : > { %v1142_v35 = vadd.f32 %v1697_v34, %v1133_v33  ;;  %v1698_v34 = vld [vmem:[%s3545_s3] ss:$0 sm:$0xff] }
 0x407   : > { %v1145_v32 = vadd.f32 3.0, %v1143_v38 }
 0x408   : > { %v1144_v36 = vadd.f32 3.0, %v1142_v35 }
 0x409   : > { %v1147_v42 = vmax.f32 %v1145_v32, 0.0 }
 0x40a   : > { %v1146_v40 = vmax.f32 %v1144_v36, 0.0 }
 0x40b   : > { %v1149_v43 = vmin.f32 %v1147_v42, 6.0 }
 0x40c   : > { %v1148_v39 = vmin.f32 %v1146_v40, 6.0 }
 0x40d   : > { %v1151_v44 = vmul.f32 %v1149_v43, %v1143_v38 }
 0x40e   : > { %v1150_v41 = vmul.f32 %v1148_v39, %v1142_v35 }
 0x40f   : > { %v1153_v47 = vmul.f32 0.16666667, %v1151_v44 }
 0x410   : > { %v1152_v46 = vmul.f32 0.16666667, %v1150_v41  ;;  %v1265_v41 = vld [vmem:[#allocation3 + $0x8] sm:$0xff] }
 0x412   : > { %1950 = vmatprep.mubr.f32.mxu1 %v1152_v46  ;;  %v1264_v46 = vld [vmem:[#allocation3] sm:$0xff] }
 0x413   : > { %1951 = vmatmul.mubr.f32.vlgmr.msra.gmra.mrb[0].mxu1 %v1153_v47 }
 0x414   : > { %2020 = vmatprep.mubr.msk.f32.mxu1 %vm2721_vm8, %v2722_v56  ;;  %2161 = vmatpush3.bf16.msra.mxu1 %v2160_v20 }
 0x415   : > { %2162 = vmatprep.subr.bf16.mxu1 %v2720_v50 }
 0x418   : > { %2164 = vmatpush3.bf16.msra.mxu1 %v2163_v37 }
 0x419   : > { %2165 = vmatprep.subr.bf16.mxu1 %v2720_v50 }
 0x41c   : > { %2167 = vmatpush3.bf16.msra.mxu1 %v2166_v10 }
 0x41d   : > { %2168 = vmatprep.subr.bf16.mxu1 %v2720_v50 }
 0x420   : > { %2170 = vmatpush3.bf16.msra.mxu1 %v2169_v12 }
 0x421   : > { %2171 = vmatprep.subr.bf16.mxu1 %v2720_v50 }
 0x424   : > { %2173 = vmatpush3.bf16.msra.mxu1 %v2172_v21 }
 0x425   : > { %2174 = vmatprep.subr.bf16.mxu1 %v2720_v50 }
 0x428   : > { %2176 = vmatpush3.bf16.msra.mxu1 %v2175_v24 }
 0x429   : > { %2177 = vmatprep.subr.bf16.mxu1 %v2720_v50 }
 0x42c   : > { %2179 = vmatpush3.bf16.msra.mxu1 %v2178_v28 }
 0x42d   : > { %2180 = vmatprep.subr.bf16.mxu1 %v2720_v50 }
 0x430   : > { %2182 = vmatpush3.bf16.msra.mxu1 %v2181_v30 }
 0x4e6   : > { %v1952_v16 = vpop.f32.mrb[0].mxu1 }
 0x4e7   : > { %v1249_v17 = vadd.f32 %v1952_v16, %v1698_v34  ;;  %v1243_v33 = vpop.f32.mrb[1].mxu1 }
 0x4e8   : > { %v1244_v38 = vadd.f32 %v1698_v34, %v1243_v33 }
 0x4e9   : > { %v1253_v35 = vsub.f32 0.0, %v1249_v17 }
 0x4ea   : > { %v1252_v32 = vsub.f32 0.0, %v1244_v38 }
 0x4eb   : > { %v1256_v36 = vmul.f32 1.442695, %v1253_v35 }
 0x4ec   : > { %v1254_v42 = vmul.f32 1.442695, %v1252_v32 }
 0x4ed   : > { %2357 = vpow2.f32 %v1256_v36 }
 0x4ee   : > { %2359 = vpow2.f32 %v1254_v42 }
 0x4f7   : > { %v2358_v40 = vpop.eup %2357 }
 0x4f8   : > { %v2360_v43 = vpop.eup %2359  ;;  %v1259_v39 = vadd.f32 1.0, %v2358_v40 }
 0x4f9   : > { %v1258_v44 = vadd.f32 1.0, %v2360_v43 }
 0x4fa   : > { %2361 = vrcp.f32 %v1259_v39 }
 0x4fb   : > { %2363 = vrcp.f32 %v1258_v44 }
 0x504   : > { %v2362_v47 = vpop.eup %2361 }
 0x505   : > { %v2364_v48 = vpop.eup %2363  ;;  %v1267_v45 = vmul.f32 %v2362_v47, %v1265_v41 }
 0x506   : > { %v1266_v49 = vmul.f32 %v2364_v48, %v1264_v46 }
 0x508   : > { %v1268_v50 = vadd.f32 %v1267_v45, %v1266_v49 }
 0x50a   : > { %v1269_v51 = vrot.slane %v1268_v50, 4 }
 0x50c   : > { %v1270_v52 = vadd.f32 %v1269_v51, %v1268_v50 }
 0x50e   : > { %v1271_v53 = vrot.slane %v1270_v52, 2 }
 0x510   : > { %v1272_v54 = vadd.f32 %v1271_v53, %v1270_v52 }
 0x512   : > { %v1273_v55 = vrot.slane %v1272_v54, 1 }
 0x514   : > { %v1274_v56 = vadd.f32 %v1273_v55, %v1272_v54 }
 0x516   : > { %v1275_v57 = vmul.f32 0.00390625, %v1274_v56 }
 0x518   : > { %1986 = vmatmul.mubr.f32.vlgmr.msra.gmra.mrb[2].mxu0 %v1275_v57 }
 0x5eb   : > { %v1359_v60 = vpop.f32.mrb[2].mxu0 }
 0x5ec   : > { %v1360_v61 = vadd.f32 %v1359_v60, %v1292_v59  ;;  %v1987_v62 = vpop.f32.mrb[3].mxu0 }
 0x5ee   : > { %v1363_v63 = vmax.f32 %v1360_v61, 0.0 }
 0x5f0   : > { %2021 = vmatmul.mubr.f32.vlgmr.msra.gmra.mrb[2].mxu1 %v1363_v63 }
 0x6c3   : > { %v1447_v2 = vpop.f32.mrb[2].mxu1 }
 0x6c4   : > { %v1448_v3 = vadd.f32 %v1447_v2, %v1380_v1  ;;  %v2022_v4 = vpop.f32.mrb[3].mxu1 }
 0x6c6   : > { %v1451_v5 = vsub.f32 0.0, %v1448_v3 }
 0x6c8   : > { %v1452_v6 = vmul.f32 1.442695, %v1451_v5 }
 0x6ca   : > { %2365 = vpow2.f32 %v1452_v6 }
 0x6d4   : > { %v2366_v7 = vpop.eup %2365 }
 0x6d5   : > { %v1454_v8 = vadd.f32 1.0, %v2366_v7 }
 0x6d7   : > { %2367 = vrcp.f32 %v1454_v8 }
 0x6e1   : > { %v2368_v14 = vpop.eup %2367 }
 0x6e2   : > { %v1460_v18 = vrot.slane %v2368_v14, %v3295_v25 }
 0x6e4   : > { %v1461_v20 = vmul.f32 %v2364_v48, %v1460_v18  ;;  %v1462_v15 = vmul.f32 %v2362_v47, %v1460_v18 }
 0x6e6   : > { %1463 = vst [vmem:[%s3280_s15] sm:$0xff] %v1461_v20  ;;  %1464 = vst [vmem:[%s3280_s15 + $0x8] sm:$0xff] %v1462_v15 }
 0x6e7 PF: > { %s3548_s6 = sld [smem:[#allocation25_spill]]  ;;  %s3549_s23 = sld [smem:[#allocation24_spill]] }
 0x6e8   : > { %s1486_s3 = sshll.u32 %s3276_s9, 4  ;;  %s3550_s22 = sld [smem:[#allocation42_spill]]  ;;  %s3363_s3 = int_to_ptr.vmem [resolvable:$true] %s1486_s3 }
 0x6e9   : > { %s1466_s19 = scalar_lea.sflag [#allocation6], %s3125_s8  ;;  %s2539_s24 = scalar_lea.vmem %s3363_s3, 128 }
 0x6ea   : > { %p2540_p12 = scmp.ne.s32.totalorder %s3363_s3, %s2539_s24  ;;  %p3551_p2 = scmp.ne.s32.totalorder %s3527_s7, 0 }
 0x6eb   : > { %s2723_s1 = smov [#allocation15]  }
 0x6ec   : > { %p2541_p11 = pnand %p2540_p12, %p3551_p2  ;;  %s2543_s17 = sshll.u32 %s2723_s1, 4  ;;  %s2544_s17 = int_to_ptr.vmem [resolvable:$false] %s2543_s17 }
 0x6ed   : > { %s1701_s10 = sshll.u32 %s3548_s6, 1  ;;  %s2545_s9 = scalar_lea.vmem %s2544_s17, 256 }
 0x6ee   : > { %s1482_s21 = sadd.s32 %s3549_s23, %s1701_s10  ;;  %p2542_p9 = pneg %p2541_p11 }
 0x6ef   : > { %s1702_s20 = sshll.u32 %s1482_s21, 7  ;;  %p2546_p3 = scmp.lt.s32.totalorder %s3363_s3, %s2544_s17 }
 0x6f0   : > { %s1484_s4 = scalar_lea.hbm %s3550_s22, %s1702_s20  ;;  %p2547_p13 = scmp.lt.s32.totalorder %s2545_s9, %s2539_s24 }
 0x6f2   : > { %p2548_p0 = por %p2547_p13, %p2546_p3 }
 0x6f4   : > { %p2549_p10 = pnand %p2548_p0, %p2542_p9 }
 0x6f6   : > { %2552 = shalt.err (!%p2549_p10)
}
 0x6f7   : > { %s2553_s23 = scalar_lea.hbm %s1484_s4, 128  ;;  %s2557_s21 = scalar_lea.hbm %s3550_s22, 512 }
 0x6f8   : > { %p2554_p7 = scmp.ne.s32.totalorder %s1484_s4, %s2553_s23  ;;  %p2558_p6 = scmp.lt.u32.totalorder %s1484_s4, %s3550_s22 }
 0x6f9   : > { %p2559_p4 = scmp.lt.u32.totalorder %s2557_s21, %s2553_s23  ;;  %p2561_p12 = scmp.lt.u32.totalorder %s2553_s23, %s1484_s4 }
 0x6fa   : > { %p2555_p1 = pnand %p2554_p7, %p3551_p2 }
 0x6fb   : > { %p2560_p5 = por %p2559_p4, %p2558_p6 }
 0x6fc   : > { %p2556_p8 = pneg %p2555_p1 }
 0x6fd   : > { %p2562_p11 = por %p2561_p12, %p2560_p5 }
 0x6ff   : > { %p2563_p9 = pnand %p2562_p11, %p2556_p8 }
 0x701   : > { %2566 = shalt.err (!%p2563_p9)
}
 0x702   : > { %2205 = dma.vmem_to_hbm [thread:$0]  (%p3551_p2), %s3363_s3, 128, %s1484_s4, %s1466_s19  }
 0x703   : > { %s1708_s17 = sshll.u32 %s3548_s6, 8  ;;  %s1499_s1 = sshll.u32 %s3280_s15, 4  ;;  %s3392_s1 = int_to_ptr.vmem [resolvable:$true] %s1499_s1 }
 0x704   : > { %s3552_s9 = sld [smem:[#allocation43_spill]]  ;;  %s3553_s23 = sand.u32 1, %s2669_s26  }
 0x705   : > { %s3396_s7 = scalar_lea.sflag [#allocation17], %s3553_s23  ;;  %s2567_s10 = scalar_lea.vmem %s3392_s1, 256 }
 0x706   : > { %p2568_p3 = scmp.ne.s32.totalorder %s3392_s1, %s2567_s10  ;;  %p3554_p13 = scmp.ne.s32.totalorder %s3529_s11, 0 }
 0x707   : > { %s2724_s6 = smov [#allocation16]  }
 0x708   : > { %p2569_p0 = pnand %p2568_p3, %p3554_p13  ;;  %s2571_s15 = sshll.u32 %s2724_s6, 4  ;;  %s2572_s15 = int_to_ptr.vmem [resolvable:$false] %s2571_s15 }
 0x709   : > { %s2573_s3 = scalar_lea.vmem %s2572_s15, 512  ;;  %p2574_p10 = scmp.lt.s32.totalorder %s3392_s1, %s2572_s15 }
 0x70a   : > { %s3390_s8 = scalar_lea.hbm %s3552_s9, %s1708_s17  ;;  %p2570_p2 = pneg %p2569_p0 }
 0x70b   : > { %p2575_p7 = scmp.lt.s32.totalorder %s2573_s3, %s2567_s10 }
 0x70d   : > { %p2576_p1 = por %p2575_p7, %p2574_p10 }
 0x70f   : > { %p2577_p8 = pnand %p2576_p1, %p2570_p2 }
 0x711   : > { %2580 = shalt.err (!%p2577_p8)
}
 0x712   : > { %s2581_s4 = scalar_lea.hbm %s3390_s8, 256  ;;  %s2585_s20 = scalar_lea.hbm %s3552_s9, 512 }
 0x713   : > { %p2582_p6 = scmp.ne.s32.totalorder %s3390_s8, %s2581_s4  ;;  %p2586_p12 = scmp.lt.u32.totalorder %s3390_s8, %s3552_s9 }
 0x714   : > { %p2587_p11 = scmp.lt.u32.totalorder %s2585_s20, %s2581_s4  ;;  %p2589_p3 = scmp.lt.u32.totalorder %s2581_s4, %s3390_s8 }
 0x715   : > { %p2583_p4 = pnand %p2582_p6, %p3554_p13 }
 0x716   : > { %p2588_p9 = por %p2587_p11, %p2586_p12 }
 0x717   : > { %p2584_p5 = pneg %p2583_p4 }
 0x718   : > { %p2590_p0 = por %p2589_p3, %p2588_p9 }
 0x71a   : > { %p2591_p2 = pnand %p2590_p0, %p2584_p5 }
 0x71c   : > { %2594 = shalt.err (!%p2591_p2)
}
 0x71d   : > { %s2725_s24 = smov 128   ;;  %s2726_s0 = smov 8  }
 0x71e   : > { %2206 = dma.vmem_to_hbm [thread:$0]  (%p3554_p13), %s3392_s1, 256, %s3390_s8, %s3396_s7, %s2725_s24, %s2725_s24, %s2726_s0  }
 0x71f PF: > { %p2247_p10 = scmp.ge.s32.totalorder %s2705_s18, 2  ;;  %s1514_s23 = sand.u32 1, %s2677_s28  }
 0x720   : > { %p3555_p7 = scmp.ne.s32.totalorder %s3528_s13, 0  ;;  %s1515_s10 = scalar_lea.sflag [#allocation6], %s1514_s23 }
 0x722   : > { %p2230_p1 = pnand %p2247_p10, %p3555_p7 }
 0x724   : > { %2656 = dma.done.wait (!%p2230_p1), %s1515_s10, 128  }
 0x725   : > { %2658 = vsyncadd (!%p2230_p1), %s1515_s10, 4294967168  ;;  %s1523_s6 = sand.u32 1, %s2665_s25   ;;  %p3556_p8 = scmp.ne.s32.totalorder %s3530_s2, 0 }
 0x726   : > { %s1524_s15 = scalar_lea.sflag [#allocation17], %s1523_s6 }
 0x727   : > { %p2233_p6 = pnand %p2247_p10, %p3556_p8 }
 0x729   : > { %2660 = dma.done.wait (!%p2233_p6), %s1524_s15, 256  }
 0x72a   : > { %2662 = vsyncadd (!%p2233_p6), %s1524_s15, 4294967040  ;;  %s36_s18 = sadd.s32 1, %s2705_s18   ;;  %s3557_s15 = sld [smem:[#allocation26_spill]] }
 0x72b   : > { %p33_p13 = scmp.ge.s32.totalorder %s36_s18, 6   ;;  %s3558_s11 = sld [smem:[#allocation28_spill]] }
 0x72c   : > { %s3559_s17 = sld [smem:[#allocation29_spill]]  ;;  %s3560_s25 = smov %s2669_s26 }
 0x72d   : > { %s3561_s26 = smov %s2673_s27  ;;  %s3562_s27 = smov %s3053_s5 }
 0x72e   : > { %s3563_s28 = smov %s2681_s29  ;;  %s3564_s29 = smov %s2685_s30 }
 0x72f   : > { %s3565_s30 = smov %s3056_s14  ;;  %s3566_s14 = smov %s2697_s16 }
 0x730   :  { %35 = sbr.rel (!%p33_p13) target bundleno = 29 (0x1d), region = 158 }
 0x731   : > { %s3567_s16 = smov %s3558_s11 }
 0x737   :  { %1529 = vsyncpa [#allocation5], 1 }
 0x738   :  { %1531 = vsyncpa [#allocation5 + $0x1], 1 }
 0x739   :  { %1532 = vsyncpa [#allocation8], 1 }
 0x73a   :  { %1533 = vsyncpa [#allocation11], 1 }
 0x73b   :  { %1534 = vsyncpa [#allocation14], 1 }
 0x73c   :  { %1535 = vsyncpa [#allocation6], 1 }
 0x73d   :  { %1537 = vsyncpa [#allocation6 + $0x1], 1 }
 0x73e   :  { %1538 = vsyncpa [#allocation17], 1 }
 0x73f   :  { %1540 = vsyncpa [#allocation17 + $0x1], 1 }

</bundles_post_ra>
